<compile_context>
chip_gen: v6e
topology: v6e:2x2x1
jax: 0.10.0
libtpu: 0.0.40
codegen_flags: <defaults>
</compile_context>

<pallas_src>
import math
import functools

import jax
import jax.numpy as jnp
from jax import lax
from jax.experimental import pallas as pl
from jax.experimental.pallas import tpu as pltpu


# ----------------------------------------------------------------------------
# Kernel 1: RMSNorm(norm1) -> QKV projection -> RoPE on q, k
# ----------------------------------------------------------------------------
def _qkv_rope_kernel(x_ref, g_ref, wqkv_ref, bqkv_ref, cos_ref, sin_ref,
                     q_ref, k_ref, v_ref, *, num_heads, head_dim, eps):
    x = x_ref[...]                                      # (tm, D) native dtype
    xf = x.astype(jnp.float32)
    var = jnp.mean(xf * xf, axis=-1, keepdims=True)
    # Qwen2RMSNorm: weight * normalized.to(input_dtype)
    xn = (xf * lax.rsqrt(var + eps)).astype(x.dtype) * g_ref[...]

    # QKV projection; MXU consumes native-dtype operands, accumulates in f32.
    qkv = jnp.dot(xn, wqkv_ref[...], preferred_element_type=jnp.float32)
    qkv = qkv + bqkv_ref[...].astype(jnp.float32)       # (tm, 3D) f32

    d = num_heads * head_dim
    q = qkv[:, :d]
    k = qkv[:, d:2 * d]
    v = qkv[:, 2 * d:]

    cos = cos_ref[...].astype(jnp.float32)              # (tm, head_dim)
    sin = sin_ref[...].astype(jnp.float32)
    half = head_dim // 2

    def rope(t):
        # static per-head loop over lane slices (no cross-tile reshape)
        outs = []
        for h in range(num_heads):
            th = t[:, h * head_dim:(h + 1) * head_dim]
            t1 = th[:, :half]
            t2 = th[:, half:]
            rot = jnp.concatenate([-t2, t1], axis=-1)
            outs.append(th * cos + rot * sin)
        return jnp.concatenate(outs, axis=-1)

    q_ref[...] = rope(q).astype(q_ref.dtype)
    k_ref[...] = rope(k).astype(k_ref.dtype)
    v_ref[...] = v.astype(v_ref.dtype)


# ----------------------------------------------------------------------------
# Kernel 2: flash-style attention with block-diagonal (segment id) masking
# grid = (num_heads, n_q_tiles, n_kv_tiles); kv axis is the reduction axis.
# ----------------------------------------------------------------------------
def _flash_attn_kernel(segq_ref, segk_ref, q_ref, k_ref, v_ref, o_ref,
                       m_sc, l_sc, acc_sc, *, scale):
    kv = pl.program_id(2)

    @pl.when(kv == 0)
    def _():
        m_sc[...] = jnp.full(m_sc.shape, -jnp.inf, jnp.float32)
        l_sc[...] = jnp.zeros(l_sc.shape, jnp.float32)
        acc_sc[...] = jnp.zeros(acc_sc.shape, jnp.float32)

    q = q_ref[...]                                      # (1, tq, hd)
    k = k_ref[...]                                      # (1, tk, hd)
    v = v_ref[...]                                      # (1, tk, hd)

    s = jnp.einsum('bqd,bkd->bqk', q, k,
                   preferred_element_type=jnp.float32) * scale   # (1, tq, tk)

    mask = segq_ref[...] == segk_ref[...]               # (tq,1)==(1,tk) -> (tq,tk)
    s = jnp.where(mask[None, :, :], s, -1e30)

    m_prev = m_sc[...]
    m_new = jnp.maximum(m_prev, s.max(axis=-1, keepdims=True))
    alpha = jnp.exp(m_prev - m_new)
    p = jnp.exp(s - m_new)

    l_sc[...] = alpha * l_sc[...] + p.sum(axis=-1, keepdims=True)
    acc_sc[...] = alpha * acc_sc[...] + jnp.einsum(
        'bqk,bkd->bqd', p.astype(v.dtype), v,
        preferred_element_type=jnp.float32)
    m_sc[...] = m_new

    @pl.when(kv == pl.num_programs(2) - 1)
    def _():
        o_ref[...] = (acc_sc[...] / l_sc[...]).astype(o_ref.dtype)


# ----------------------------------------------------------------------------
# Kernel 3: attn proj + residual -> RMSNorm(norm2) -> SwiGLU MLP -> residual
# ----------------------------------------------------------------------------
def _proj_mlp_kernel(x_ref, a_ref, wp_ref, bp_ref, g2_ref,
                     wg_ref, bg_ref, wu_ref, bu_ref, wd_ref, bd_ref,
                     o_ref, *, eps):
    x = x_ref[...]                                      # residual input (tm, D)
    attn = a_ref[...]                                   # attention out  (tm, D)

    proj = jnp.dot(attn, wp_ref[...], preferred_element_type=jnp.float32)
    proj = proj + bp_ref[...].astype(jnp.float32)
    h = x.astype(jnp.float32) + proj                    # after attn residual

    # RMSNorm2
    var = jnp.mean(h * h, axis=-1, keepdims=True)
    xn = (h * lax.rsqrt(var + eps)).astype(x.dtype) * g2_ref[...]

    gate = jnp.dot(xn, wg_ref[...], preferred_element_type=jnp.float32)
    gate = gate + bg_ref[...].astype(jnp.float32)
    up = jnp.dot(xn, wu_ref[...], preferred_element_type=jnp.float32)
    up = up + bu_ref[...].astype(jnp.float32)

    act = (gate * lax.logistic(gate)) * up              # SiLU(gate) * up, f32

    down = jnp.dot(act.astype(x.dtype), wd_ref[...],
                   preferred_element_type=jnp.float32)
    down = down + bd_ref[...].astype(jnp.float32)

    o_ref[...] = (h + down).astype(o_ref.dtype)


# ----------------------------------------------------------------------------
# Wrapper
# ----------------------------------------------------------------------------
def qwen25_vl_vision_block(x, cu_seqlens, cos, sin, params, *,
                           num_heads, eps=1e-6, tile=128):
    """x: (seq, dim). cos/sin: (seq, head_dim). Returns (seq, dim)."""
    S, D = x.shape
    hd = D // num_heads
    inter = params["wgate"].shape[1]
    scale = 1.0 / math.sqrt(hd)

    Sp = ((S + tile - 1) // tile) * tile
    pad = Sp - S

    seg = (jnp.searchsorted(cu_seqlens.astype(jnp.int32),
                            jnp.arange(S, dtype=jnp.int32),
                            side="right").astype(jnp.int32) - 1)
    if pad:
        x_p = jnp.pad(x, ((0, pad), (0, 0)))
        cos_p = jnp.pad(cos, ((0, pad), (0, 0)))
        sin_p = jnp.pad(sin, ((0, pad), (0, 0)))
        seg_p = jnp.pad(seg, (0, pad), constant_values=-1)
    else:
        x_p, cos_p, sin_p, seg_p = x, cos, sin, seg

    n_m = Sp // tile
    cparams = pltpu.CompilerParams(
        dimension_semantics=("parallel",),
        vmem_limit_bytes=64 * 1024 * 1024)

    # ---- kernel 1: norm1 + qkv + rope -----------------------------------
    g1 = params["norm1_w"].reshape(1, D)
    bqkv = params["bqkv"].reshape(1, 3 * D)

    q2, k2, v2 = pl.pallas_call(
        functools.partial(_qkv_rope_kernel, num_heads=num_heads,
                          head_dim=hd, eps=eps),
        out_shape=(jax.ShapeDtypeStruct((Sp, D), x.dtype),) * 3,
        grid=(n_m,),
        in_specs=[
            pl.BlockSpec((tile, D), lambda i: (i, 0)),      # x tile
            pl.BlockSpec((1, D), lambda i: (0, 0)),         # norm1 weight
            pl.BlockSpec((D, 3 * D), lambda i: (0, 0)),     # Wqkv
            pl.BlockSpec((1, 3 * D), lambda i: (0, 0)),     # bqkv
            pl.BlockSpec((tile, hd), lambda i: (i, 0)),     # cos
            pl.BlockSpec((tile, hd), lambda i: (i, 0)),     # sin
        ],
        out_specs=(pl.BlockSpec((tile, D), lambda i: (i, 0)),) * 3,
        compiler_params=cparams,
        cost_estimate=pl.CostEstimate(
            flops=2 * Sp * D * 3 * D,
            transcendentals=Sp,
            bytes_accessed=4 * (4 * Sp * D + 3 * D * D + 2 * Sp * hd)),
    )(x_p, g1, params["wqkv"], bqkv, cos_p, sin_p)

    # layout plumbing in plain XLA (no in-kernel relayout): (S, H*hd) -> (H, S, hd)
    q4 = q2.reshape(Sp, num_heads, hd).transpose(1, 0, 2)
    k4 = k2.reshape(Sp, num_heads, hd).transpose(1, 0, 2)
    v4 = v2.reshape(Sp, num_heads, hd).transpose(1, 0, 2)

    seg_col = seg_p.reshape(Sp, 1)
    seg_row = seg_p.reshape(1, Sp)

    # ---- kernel 2: attention --------------------------------------------
    o4 = pl.pallas_call(
        functools.partial(_flash_attn_kernel, scale=scale),
        out_shape=jax.ShapeDtypeStruct((num_heads, Sp, hd), x.dtype),
        grid=(num_heads, n_m, n_m),
        in_specs=[
            pl.BlockSpec((tile, 1), lambda h, qi, ki: (qi, 0)),     # seg (q)
            pl.BlockSpec((1, tile), lambda h, qi, ki: (0, ki)),     # seg (k)
            pl.BlockSpec((1, tile, hd), lambda h, qi, ki: (h, qi, 0)),
            pl.BlockSpec((1, tile, hd), lambda h, qi, ki: (h, ki, 0)),
            pl.BlockSpec((1, tile, hd), lambda h, qi, ki: (h, ki, 0)),
        ],
        out_specs=pl.BlockSpec((1, tile, hd), lambda h, qi, ki: (h, qi, 0)),
        scratch_shapes=[
            pltpu.VMEM((1, tile, 1), jnp.float32),   # m
            pltpu.VMEM((1, tile, 1), jnp.float32),   # l
            pltpu.VMEM((1, tile, hd), jnp.float32),  # acc
        ],
        compiler_params=pltpu.CompilerParams(
            dimension_semantics=("parallel", "parallel", "arbitrary"),
            vmem_limit_bytes=64 * 1024 * 1024),
        cost_estimate=pl.CostEstimate(
            flops=4 * num_heads * Sp * Sp * hd,
            transcendentals=num_heads * Sp * Sp,
            bytes_accessed=4 * (4 * num_heads * Sp * hd + 2 * Sp)),
    )(seg_col, seg_row, q4, k4, v4)

    attn_flat = o4.transpose(1, 0, 2).reshape(Sp, D)

    # ---- kernel 3: proj + residual + norm2 + MLP + residual --------------
    g2 = params["norm2_w"].reshape(1, D)
    bp = params["bproj"].reshape(1, D)
    bg = params["bgate"].reshape(1, inter)
    bu = params["bup"].reshape(1, inter)
    bd = params["bdown"].reshape(1, D)

    out_p = pl.pallas_call(
        functools.partial(_proj_mlp_kernel, eps=eps),
        out_shape=jax.ShapeDtypeStruct((Sp, D), x.dtype),
        grid=(n_m,),
        in_specs=[
            pl.BlockSpec((tile, D), lambda i: (i, 0)),          # x residual
            pl.BlockSpec((tile, D), lambda i: (i, 0)),          # attn out
            pl.BlockSpec((D, D), lambda i: (0, 0)),             # Wproj
            pl.BlockSpec((1, D), lambda i: (0, 0)),             # bproj
            pl.BlockSpec((1, D), lambda i: (0, 0)),             # norm2 w
            pl.BlockSpec((D, inter), lambda i: (0, 0)),         # Wgate
            pl.BlockSpec((1, inter), lambda i: (0, 0)),         # bgate
            pl.BlockSpec((D, inter), lambda i: (0, 0)),         # Wup
            pl.BlockSpec((1, inter), lambda i: (0, 0)),         # bup
            pl.BlockSpec((inter, D), lambda i: (0, 0)),         # Wdown
            pl.BlockSpec((1, D), lambda i: (0, 0)),             # bdown
        ],
        out_specs=pl.BlockSpec((tile, D), lambda i: (i, 0)),
        compiler_params=cparams,
        cost_estimate=pl.CostEstimate(
            flops=2 * Sp * (D * D + 3 * D * inter),
            transcendentals=Sp * inter + Sp,
            bytes_accessed=4 * (3 * Sp * D + D * D + 3 * D * inter)),
    )(x_p, attn_flat, params["wproj"], bp, g2,
      params["wgate"], bg, params["wup"], bu, params["wdown"], bd)

    return out_p[:S]


# ----------------------------------------------------------------------------
# Pure-JAX reference mirroring the PyTorch sdpa forward
# ----------------------------------------------------------------------------
def qwen25_vl_vision_block_ref(x, cu_seqlens, cos, sin, params, *,
                               num_heads, eps=1e-6):
    S, D = x.shape
    hd = D // num_heads

    def rms(h, w):
        hf = h.astype(jnp.float32)
        var = jnp.mean(hf * hf, axis=-1, keepdims=True)
        return w * (hf * lax.rsqrt(var + eps)).astype(h.dtype)

    xn = rms(x, params["norm1_w"])
    qkv = xn @ params["wqkv"] + params["bqkv"]
    qkv = qkv.reshape(S, 3, num_heads, hd)
    q, k, v = qkv[:, 0], qkv[:, 1], qkv[:, 2]           # (S, H, hd)

    cosf = cos[:, None, :].astype(jnp.float32)
    sinf = sin[:, None, :].astype(jnp.float32)

    def rot_half(t):
        t1, t2 = t[..., :hd // 2], t[..., hd // 2:]
        return jnp.concatenate([-t2, t1], axis=-1)

    qf, kf = q.astype(jnp.float32), k.astype(jnp.float32)
    q = (qf * cosf + rot_half(qf) * sinf).astype(q.dtype)
    k = (kf * cosf + rot_half(kf) * sinf).astype(k.dtype)

    seg = jnp.searchsorted(cu_seqlens.astype(jnp.int32),
                           jnp.arange(S, dtype=jnp.int32), side="right") - 1
    mask = seg[:, None] == seg[None, :]

    qh, kh, vh = (t.transpose(1, 0, 2) for t in (q, k, v))   # (H, S, hd)
    scores = jnp.einsum('hqd,hkd->hqk', qh, kh) / math.sqrt(hd)
    scores = jnp.where(mask[None], scores, jnp.finfo(jnp.float32).min)
    w = jax.nn.softmax(scores.astype(jnp.float32), axis=-1).astype(q.dtype)
    attn = jnp.einsum('hqk,hkd->hqd', w, vh)
    attn = attn.transpose(1, 0, 2).reshape(S, D)

    h = x + attn @ params["wproj"] + params["bproj"]
    xn2 = rms(h, params["norm2_w"])
    gate = xn2 @ params["wgate"] + params["bgate"]
    up = xn2 @ params["wup"] + params["bup"]
    act = jax.nn.silu(gate) * up
    return h + act @ params["wdown"] + params["bdown"]


if __name__ == "__main__":
    # Small but lane-aligned shapes consistent with the module.
    D = 128                  # config.hidden_size
    num_heads = 2
    hd = D // num_heads      # 64
    inter = 256              # config.intermediate_size
    S = 192                  # total vision tokens (two images: 128 + 64)
    cu_seqlens = jnp.array([0, 128, 192], dtype=jnp.int32)

    key = jax.random.PRNGKey(0)
    keys = jax.random.split(key, 12)

    x = jax.random.normal(keys[0], (S, D), jnp.float32)

    # position_embeddings (cos, sin) as produced by the vision rotary module
    inv_freq = 1.0 / (10000.0 ** (jnp.arange(0, hd, 2, dtype=jnp.float32) / hd))
    freqs = jnp.arange(S, dtype=jnp.float32)[:, None] * inv_freq[None, :]
    emb = jnp.concatenate([freqs, freqs], axis=-1)       # (S, hd)
    cos, sin = jnp.cos(emb), jnp.sin(emb)

    def lin(k, fan_in, shape):
        return jax.random.normal(k, shape, jnp.float32) / math.sqrt(fan_in)

    # Weights stored as (in_features, out_features)
    params = {
        "norm1_w": 1.0 + 0.01 * jax.random.normal(keys[1], (D,), jnp.float32),
        "norm2_w": 1.0 + 0.01 * jax.random.normal(keys[2], (D,), jnp.float32),
        "wqkv": lin(keys[3], D, (D, 3 * D)),
        "bqkv": 0.01 * jax.random.normal(keys[4], (3 * D,), jnp.float32),
        "wproj": lin(keys[5], D, (D, D)),
        "bproj": 0.01 * jax.random.normal(keys[6], (D,), jnp.float32),
        "wgate": lin(keys[7], D, (D, inter)),
        "bgate": 0.01 * jax.random.normal(keys[8], (inter,), jnp.float32),
        "wup": lin(keys[9], D, (D, inter)),
        "bup": 0.01 * jax.random.normal(keys[10], (inter,), jnp.float32),
        "wdown": lin(keys[11], inter, (inter, D)),
        "bdown": jnp.zeros((D,), jnp.float32),
    }

    out = qwen25_vl_vision_block(x, cu_seqlens, cos, sin, params,
                                 num_heads=num_heads)
    out = jax.block_until_ready(out)

    ref = qwen25_vl_vision_block_ref(x, cu_seqlens, cos, sin, params,
                                     num_heads=num_heads)
    assert out.shape == (S, D)
    max_err = float(jnp.max(jnp.abs(out - ref)))
    assert jnp.allclose(out, ref, atol=2e-3, rtol=2e-3), max_err

    print("KERNEL_OK")
</pallas_src>

<mosaic_0001>
module attributes {stable_mosaic.version = 11 : i64} {
  func.func @_qkv_rope_kernel(%arg0: i32, %arg1: memref<128x128xf32, #tpu.memory_space<vmem>>, %arg2: memref<1x128xf32, #tpu.memory_space<vmem>>, %arg3: memref<128x384xf32, #tpu.memory_space<vmem>>, %arg4: memref<1x384xf32, #tpu.memory_space<vmem>>, %arg5: memref<128x64xf32, #tpu.memory_space<vmem>>, %arg6: memref<128x64xf32, #tpu.memory_space<vmem>>, %arg7: memref<128x128xf32, #tpu.memory_space<vmem>>, %arg8: memref<128x128xf32, #tpu.memory_space<vmem>>, %arg9: memref<128x128xf32, #tpu.memory_space<vmem>>) attributes {dimension_semantics = [#tpu.dimension_semantics<parallel>], iteration_bounds = array<i64: 2>, scalar_prefetch = 0 : i64, scratch_operands = 0 : i64, tpu.core_type = #tpu.core_type<tc>, window_params = [{transform_indices = @transform_0, window_bounds = array<i64: 128, 128>}, {pipeline_mode = #tpu.pipeline_mode<synchronous>, transform_indices = @transform_1, window_bounds = array<i64: 1, 128>}, {pipeline_mode = #tpu.pipeline_mode<synchronous>, transform_indices = @transform_2, window_bounds = array<i64: 128, 384>}, {pipeline_mode = #tpu.pipeline_mode<synchronous>, transform_indices = @transform_3, window_bounds = array<i64: 1, 384>}, {transform_indices = @transform_4, window_bounds = array<i64: 128, 64>}, {transform_indices = @transform_5, window_bounds = array<i64: 128, 64>}, {transform_indices = @transform_6, window_bounds = array<i64: 128, 128>}, {transform_indices = @transform_7, window_bounds = array<i64: 128, 128>}, {transform_indices = @transform_8, window_bounds = array<i64: 128, 128>}]} {
    %c0 = arith.constant 0 : index
    %c0_0 = arith.constant 0 : index
    %0 = vector.load %arg1[%c0, %c0_0] : memref<128x128xf32, #tpu.memory_space<vmem>>, vector<128x128xf32>
    %1 = arith.mulf %0, %0 : vector<128x128xf32>
    %cst = arith.constant dense<0.000000e+00> : vector<128xf32>
    %2 = vector.multi_reduction <add>, %1, %cst [1] : vector<128x128xf32> to vector<128xf32>
    %3 = vector.shape_cast %2 : vector<128xf32> to vector<128x1xf32>
    %cst_1 = arith.constant 1.280000e+02 : f32
    %4 = vector.broadcast %cst_1 : f32 to vector<128x1xf32>
    %5 = arith.divf %3, %4 : vector<128x1xf32>
    %cst_2 = arith.constant 9.99999997E-7 : f32
    %6 = vector.broadcast %cst_2 : f32 to vector<128x1xf32>
    %7 = arith.addf %5, %6 : vector<128x1xf32>
    %8 = math.rsqrt %7 : vector<128x1xf32>
    %9 = vector.broadcast %8 : vector<128x1xf32> to vector<128x128xf32>
    %10 = arith.mulf %0, %9 : vector<128x128xf32>
    %c0_3 = arith.constant 0 : index
    %c0_4 = arith.constant 0 : index
    %11 = vector.load %arg2[%c0_3, %c0_4] : memref<1x128xf32, #tpu.memory_space<vmem>>, vector<1x128xf32>
    %12 = vector.broadcast %11 : vector<1x128xf32> to vector<128x128xf32>
    %13 = arith.mulf %10, %12 : vector<128x128xf32>
    %c0_5 = arith.constant 0 : index
    %c0_6 = arith.constant 0 : index
    %14 = vector.load %arg3[%c0_5, %c0_6] : memref<128x384xf32, #tpu.memory_space<vmem>>, vector<128x384xf32>
    %cst_7 = arith.constant dense<0.000000e+00> : vector<128x384xf32>
    %15 = tpu.matmul %13, %14, %cst_7 {dimension_numbers = #tpu.dot_dimension_numbers<[1], [0], [0], [1], [0, 0, 1, 1], [], []>} : vector<128x128xf32>, vector<128x384xf32>, vector<128x384xf32> -> vector<128x384xf32>
    %c0_8 = arith.constant 0 : index
    %c0_9 = arith.constant 0 : index
    %16 = vector.load %arg4[%c0_8, %c0_9] : memref<1x384xf32, #tpu.memory_space<vmem>>, vector<1x384xf32>
    %17 = vector.broadcast %16 : vector<1x384xf32> to vector<128x384xf32>
    %18 = arith.addf %15, %17 : vector<128x384xf32>
    %19 = vector.extract_strided_slice %18 {offsets = [0, 0], sizes = [128, 128], strides = [1, 1]} : vector<128x384xf32> to vector<128x128xf32>
    %20 = vector.extract_strided_slice %18 {offsets = [0, 128], sizes = [128, 128], strides = [1, 1]} : vector<128x384xf32> to vector<128x128xf32>
    %21 = vector.extract_strided_slice %18 {offsets = [0, 256], sizes = [128, 128], strides = [1, 1]} : vector<128x384xf32> to vector<128x128xf32>
    %c0_10 = arith.constant 0 : index
    %c0_11 = arith.constant 0 : index
    %22 = vector.load %arg5[%c0_10, %c0_11] : memref<128x64xf32, #tpu.memory_space<vmem>>, vector<128x64xf32>
    %c0_12 = arith.constant 0 : index
    %c0_13 = arith.constant 0 : index
    %23 = vector.load %arg6[%c0_12, %c0_13] : memref<128x64xf32, #tpu.memory_space<vmem>>, vector<128x64xf32>
    %24 = vector.extract_strided_slice %19 {offsets = [0, 0], sizes = [128, 64], strides = [1, 1]} : vector<128x128xf32> to vector<128x64xf32>
    %25 = vector.extract_strided_slice %24 {offsets = [0, 0], sizes = [128, 32], strides = [1, 1]} : vector<128x64xf32> to vector<128x32xf32>
    %26 = vector.extract_strided_slice %24 {offsets = [0, 32], sizes = [128, 32], strides = [1, 1]} : vector<128x64xf32> to vector<128x32xf32>
    %cst_14 = arith.constant 0.000000e+00 : f32
    %27 = vector.broadcast %cst_14 : f32 to vector<128x32xf32>
    %28 = arith.subf %27, %26 : vector<128x32xf32>
    %29 = tpu.concatenate %28, %25 in 1 : vector<128x32xf32>, vector<128x32xf32> -> vector<128x64xf32>
    %30 = arith.mulf %24, %22 : vector<128x64xf32>
    %31 = arith.mulf %29, %23 : vector<128x64xf32>
    %32 = arith.addf %30, %31 : vector<128x64xf32>
    %33 = vector.extract_strided_slice %19 {offsets = [0, 64], sizes = [128, 64], strides = [1, 1]} : vector<128x128xf32> to vector<128x64xf32>
    %34 = vector.extract_strided_slice %33 {offsets = [0, 0], sizes = [128, 32], strides = [1, 1]} : vector<128x64xf32> to vector<128x32xf32>
    %35 = vector.extract_strided_slice %33 {offsets = [0, 32], sizes = [128, 32], strides = [1, 1]} : vector<128x64xf32> to vector<128x32xf32>
    %cst_15 = arith.constant 0.000000e+00 : f32
    %36 = vector.broadcast %cst_15 : f32 to vector<128x32xf32>
    %37 = arith.subf %36, %35 : vector<128x32xf32>
    %38 = tpu.concatenate %37, %34 in 1 : vector<128x32xf32>, vector<128x32xf32> -> vector<128x64xf32>
    %39 = arith.mulf %33, %22 : vector<128x64xf32>
    %40 = arith.mulf %38, %23 : vector<128x64xf32>
    %41 = arith.addf %39, %40 : vector<128x64xf32>
    %42 = tpu.concatenate %32, %41 in 1 : vector<128x64xf32>, vector<128x64xf32> -> vector<128x128xf32>
    %c0_16 = arith.constant 0 : index
    %c0_17 = arith.constant 0 : index
    %43 = vector.load %arg7[%c0_16, %c0_17] : memref<128x128xf32, #tpu.memory_space<vmem>>, vector<128x128xf32>
    tpu.vector_store %arg7[%c0_16, %c0_17], %42 {strides = array<i32>} : memref<128x128xf32, #tpu.memory_space<vmem>>, vector<128x128xf32>,
    %44 = vector.extract_strided_slice %20 {offsets = [0, 0], sizes = [128, 64], strides = [1, 1]} : vector<128x128xf32> to vector<128x64xf32>
    %45 = vector.extract_strided_slice %44 {offsets = [0, 0], sizes = [128, 32], strides = [1, 1]} : vector<128x64xf32> to vector<128x32xf32>
    %46 = vector.extract_strided_slice %44 {offsets = [0, 32], sizes = [128, 32], strides = [1, 1]} : vector<128x64xf32> to vector<128x32xf32>
    %cst_18 = arith.constant 0.000000e+00 : f32
    %47 = vector.broadcast %cst_18 : f32 to vector<128x32xf32>
    %48 = arith.subf %47, %46 : vector<128x32xf32>
    %49 = tpu.concatenate %48, %45 in 1 : vector<128x32xf32>, vector<128x32xf32> -> vector<128x64xf32>
    %50 = arith.mulf %44, %22 : vector<128x64xf32>
    %51 = arith.mulf %49, %23 : vector<128x64xf32>
    %52 = arith.addf %50, %51 : vector<128x64xf32>
    %53 = vector.extract_strided_slice %20 {offsets = [0, 64], sizes = [128, 64], strides = [1, 1]} : vector<128x128xf32> to vector<128x64xf32>
    %54 = vector.extract_strided_slice %53 {offsets = [0, 0], sizes = [128, 32], strides = [1, 1]} : vector<128x64xf32> to vector<128x32xf32>
    %55 = vector.extract_strided_slice %53 {offsets = [0, 32], sizes = [128, 32], strides = [1, 1]} : vector<128x64xf32> to vector<128x32xf32>
    %cst_19 = arith.constant 0.000000e+00 : f32
    %56 = vector.broadcast %cst_19 : f32 to vector<128x32xf32>
    %57 = arith.subf %56, %55 : vector<128x32xf32>
    %58 = tpu.concatenate %57, %54 in 1 : vector<128x32xf32>, vector<128x32xf32> -> vector<128x64xf32>
    %59 = arith.mulf %53, %22 : vector<128x64xf32>
    %60 = arith.mulf %58, %23 : vector<128x64xf32>
    %61 = arith.addf %59, %60 : vector<128x64xf32>
    %62 = tpu.concatenate %52, %61 in 1 : vector<128x64xf32>, vector<128x64xf32> -> vector<128x128xf32>
    %c0_20 = arith.constant 0 : index
    %c0_21 = arith.constant 0 : index
    %63 = vector.load %arg8[%c0_20, %c0_21] : memref<128x128xf32, #tpu.memory_space<vmem>>, vector<128x128xf32>
    tpu.vector_store %arg8[%c0_20, %c0_21], %62 {strides = array<i32>} : memref<128x128xf32, #tpu.memory_space<vmem>>, vector<128x128xf32>,
    %c0_22 = arith.constant 0 : index
    %c0_23 = arith.constant 0 : index
    %64 = vector.load %arg9[%c0_22, %c0_23] : memref<128x128xf32, #tpu.memory_space<vmem>>, vector<128x128xf32>
    tpu.vector_store %arg9[%c0_22, %c0_23], %21 {strides = array<i32>} : memref<128x128xf32, #tpu.memory_space<vmem>>, vector<128x128xf32>,
    return
  }
  func.func @transform_0(%arg0: i32) -> (i32, i32) {
    %c0_i32 = arith.constant 0 : i32
    %c0_i32_0 = arith.constant 0 : i32
    return %arg0, %c0_i32 : i32, i32
  }
  func.func @transform_1(%arg0: i32) -> (i32, i32) {
    %c0_i32 = arith.constant 0 : i32
    %c0_i32_0 = arith.constant 0 : i32
    %c0_i32_1 = arith.constant 0 : i32
    return %c0_i32, %c0_i32_0 : i32, i32
  }
  func.func @transform_2(%arg0: i32) -> (i32, i32) {
    %c0_i32 = arith.constant 0 : i32
    %c0_i32_0 = arith.constant 0 : i32
    %c0_i32_1 = arith.constant 0 : i32
    return %c0_i32, %c0_i32_0 : i32, i32
  }
  func.func @transform_3(%arg0: i32) -> (i32, i32) {
    %c0_i32 = arith.constant 0 : i32
    %c0_i32_0 = arith.constant 0 : i32
    %c0_i32_1 = arith.constant 0 : i32
    return %c0_i32, %c0_i32_0 : i32, i32
  }
  func.func @transform_4(%arg0: i32) -> (i32, i32) {
    %c0_i32 = arith.constant 0 : i32
    %c0_i32_0 = arith.constant 0 : i32
    return %arg0, %c0_i32 : i32, i32
  }
  func.func @transform_5(%arg0: i32) -> (i32, i32) {
    %c0_i32 = arith.constant 0 : i32
    %c0_i32_0 = arith.constant 0 : i32
    return %arg0, %c0_i32 : i32, i32
  }
  func.func @transform_6(%arg0: i32) -> (i32, i32) {
    %c0_i32 = arith.constant 0 : i32
    %c0_i32_0 = arith.constant 0 : i32
    return %arg0, %c0_i32 : i32, i32
  }
  func.func @transform_7(%arg0: i32) -> (i32, i32) {
    %c0_i32 = arith.constant 0 : i32
    %c0_i32_0 = arith.constant 0 : i32
    return %arg0, %c0_i32 : i32, i32
  }
  func.func @transform_8(%arg0: i32) -> (i32, i32) {
    %c0_i32 = arith.constant 0 : i32
    %c0_i32_0 = arith.constant 0 : i32
    return %arg0, %c0_i32 : i32, i32
  }
}

</mosaic_0001>

<bundles_post_ra>
// kernel: tpu_custom_call.1
= control target key start
LH: loop header
LB: loop body
LE: loop exit
PB: predicated region body
PF: predicated region fallthrough
CT: control target
= control target key end

     0   :  { %s4038_s0 = inlined_call_operand.vmem [shape: f32[256,128], index: 0, kind: input, shape index: {}]   ;;  %s4039_s1 = inlined_call_operand.vmem [shape: f32[1,128], index: 1, kind: input, shape index: {}]   ;;  %s4040_s2 = inlined_call_operand.vmem [shape: f32[128,384], index: 2, kind: input, shape index: {}]   ;;  %s4041_s3 = inlined_call_operand.vmem [shape: f32[1,384], index: 3, kind: input, shape index: {}]   ;;  %s4042_s4 = inlined_call_operand.vmem [shape: f32[256,64], index: 4, kind: input, shape index: {}]   ;;  %s4043_s5 = inlined_call_operand.vmem [shape: f32[256,64], index: 5, kind: input, shape index: {}]   ;;  %s4044_s6 = inlined_call_operand.hbm [shape: f32[256,128], index: 6, kind: output, shape index: {0}]   ;;  %s4045_s7 = inlined_call_operand.hbm [shape: f32[256,128], index: 7, kind: output, shape index: {1}]   ;;  %s4046_s8 = inlined_call_operand.hbm [shape: f32[256,128], index: 8, kind: output, shape index: {2}]  }
   0x1   :  { %4109 = sst [smem:[#allocation65_spill]] %s4038_s0 }
   0x2   :  { %4110 = sst [smem:[#allocation66_spill]] %s4039_s1 }
   0x3   :  { %14 = vsyncpa [#allocation3], 0 }
   0x4   :  { %16 = vsyncpa [#allocation3 + $0x1], 0 }
   0x5   :  { %17 = vsyncpa [#allocation5], 0 }
   0x6   :  { %19 = vsyncpa [#allocation5 + $0x1], 0  ;;  %s2526_s27 = smov 0   ;;  %s2528_s28 = smov 0  }
   0x7   :  { %s2530_s29 = smov 0   ;;  %s2532_s30 = smov 0  }
   0x8 LB: > { %s2547_s9 = sadd.s32 4294967295, %s2470_s30   ;;  %s4108_s10 = sadd.s32 4294967294, %s2470_s30   ;;  %s2470_s30 = sphi %s2532_s30, %s4231_s30   ;;  %s2466_s29 = sphi %s2530_s29, %s4230_s29   ;;  %s2462_s28 = sphi %s2528_s28, %s4229_s28   ;;  %s2458_s27 = sphi %s2526_s27, %s4228_s27  }
   0x9   : > { %s2551_s11 = sadd.s32 1, %s2470_s30   ;;  %s173_s12 = sadd.s32 1, %s2466_s29 }
   0xa   : > { %s170_s13 = ssub.s32 %s2470_s30, %s2551_s11  ;;  %p183_p0 = scmp.ne.s32.totalorder %s2466_s29, %s2462_s28 }
   0xb   : > { %p171_p1 = scmp.eq.s32.totalorder %s170_s13, 0  ;;  %p184_p2 = scmp.eq.s32.totalorder %s2547_s9, 1 }
   0xc   : > { %p189_p3 = scmp.ne.s32.totalorder %s2462_s28, %s2458_s27  ;;  %p190_p4 = scmp.eq.s32.totalorder %s4108_s10, 1 }
   0xd   : > { %s2564_s14 = scalar_select %p171_p1, %s2466_s29, %s173_s12  }
   0xe   : > { %p2566_p5 = por %p184_p2, %p183_p0  ;;  %p2570_p6 = por %p190_p4, %p189_p3 }
   0xf   : > { %p2142_p7 = scmp.ge.s32.totalorder %s2470_s30, 1  ;;  %p296_p8 = scmp.lt.s32.totalorder %s2470_s30, 3 }
  0x11   : > { %p297_p9 = pnand %p2142_p7, %p296_p8 }
  0x13   : > { %300 = sbr.rel (%p297_p9) target bundleno = 929 (0x3a1), region = 44 }
  0x18   : > { %s2146_s17 = sshll.u32 %s2547_s9, 4  ;;  %v569_v0 = vld [vmem:[%s4040_s2 + $0x170] sm:$0xff]  ;;  %v568_v1 = vld [vmem:[%s4040_s2 + $0x168] sm:$0xff]  ;;  %v566_v2 = vld [vmem:[%s4040_s2 + $0x158] sm:$0xff]  ;;  %s4113_s0 = sld [smem:[#allocation65_spill]]  ;;  %vm1070_vm0 = vcmask 261120  }
  0x19   : > { %p351_p10 = scmp.lt.s32.totalorder %s2146_s17, 31  ;;  %588 = vmatprep.subr.mxu0 %v569_v0  ;;  %v565_v3 = vld [vmem:[%s4040_s2 + $0x150] sm:$0xff]  ;;  %v570_v4 = vld [vmem:[%s4040_s2 + $0x178] sm:$0xff]  ;;  %v563_v5 = vld [vmem:[%s4040_s2 + $0x140] sm:$0xff]  ;;  %s4114_s1 = sld [smem:[#allocation66_spill]]  ;;  %vm1423_vm1 = vcmask 523264  }
  0x1a   : > { %589 = vmatpush1.msra.mxu0 %v568_v1  ;;  %2199 = vmatprep.subr.mxu1 %v570_v4  ;;  %v567_v6 = vld [vmem:[%s4040_s2 + $0x160] sm:$0xff]  ;;  %v562_v7 = vld [vmem:[%s4040_s2 + $0x138] sm:$0xff]  ;;  %v564_v8 = vld [vmem:[%s4040_s2 + $0x148] sm:$0xff]  ;;  %s333_s19 = sand.u32 1, %s2462_s28   ;;  %s2474_s22 = smov 32  }
  0x1b   : > { %s4233_s17 = smov (!%p351_p10, %s2146_s17), 31  ;;  %590 = vmatprep.subr.mxu0 %v566_v2  ;;  %2200 = vmatpush3.msra.mxu1 %v570_v4  ;;  %v560_v9 = vld [vmem:[%s4040_s2 + $0x128] sm:$0xff]  ;;  %v559_v10 = vld [vmem:[%s4040_s2 + $0x120] sm:$0xff]  ;;  %v557_v11 = vld [vmem:[%s4040_s2 + $0x110] sm:$0xff]  ;;  %s2926_s20 = sshll.u32 %s333_s19, 7 }
  0x1c   : > { %591 = vmatpush1.msra.mxu0 %v565_v3  ;;  %2201 = vmatprep.subr.mxu1 %v567_v6  ;;  %s2607_s12 = sshll.u32 %s4233_s17, 3  ;;  %v556_v18 = vld [vmem:[%s4040_s2 + $0x108] sm:$0xff]  ;;  %v554_v31 = vld [vmem:[%s4040_s2 + $0xf8] sm:$0xff]  ;;  %v561_v32 = vld [vmem:[%s4040_s2 + $0x130] sm:$0xff]  ;;  %s2937_s17 = scalar_lea.vmem [#allocation6], %s2926_s20 }
  0x1d   : > { %592 = vmatprep.subr.mxu0 %v563_v5  ;;  %2202 = vmatpush3.msra.mxu1 %v567_v6  ;;  %v553_v33 = vld [vmem:[%s4040_s2 + $0xf0] sm:$0xff]  ;;  %v551_v34 = vld [vmem:[%s4040_s2 + $0xe0] sm:$0xff]  ;;  %v558_v35 = vld [vmem:[%s4040_s2 + $0x118] sm:$0xff]  ;;  %s2814_s24 = scalar_lea.vmem %s4042_s4, %s2607_s12  ;;  %s2475_s23 = smov 96  }
  0x1e   : > { %s2616_s21 = scalar_lea.vmem %s4113_s0, %s2607_s12  ;;  %593 = vmatpush1.msra.mxu0 %v562_v7  ;;  %2203 = vmatprep.subr.mxu1 %v564_v8  ;;  %v550_v39 = vld [vmem:[%s4040_s2 + $0xd8] sm:$0xff]  ;;  %v548_v41 = vld [vmem:[%s4040_s2 + $0xc8] sm:$0xff]  ;;  %v555_v42 = vld [vmem:[%s4040_s2 + $0x100] sm:$0xff]  ;;  %s3149_s13 = scalar_lea.vmem %s4043_s5, %s2607_s12 }
  0x1f   : > { %v2622_v12 = vld [vmem:[%s2616_s21] sm:$0xff]  ;;  %v2625_v13 = vld [vmem:[%s2616_s21 + $0x8] sm:$0xff]  ;;  %v2628_v14 = vld [vmem:[%s2616_s21 + $0x10] sm:$0xff]  ;;  %594 = vmatprep.subr.mxu0 %v560_v9  ;;  %2204 = vmatpush3.msra.mxu1 %v564_v8  ;;  %s3699_s12 = scalar_lea.vmem [#allocation2], %s2926_s20  ;;  %s3710_s18 = scalar_lea.vmem [#allocation4], %s2926_s20 }
  0x20   : > { %v387_v15 = vmul.f32 %v2622_v12, %v2622_v12  ;;  %v389_v16 = vmul.f32 %v2628_v14, %v2628_v14  ;;  %v2635_v17 = vld [vmem:[%s2616_s21 + $0x18] sm:$0xff]  ;;  %595 = vmatpush1.msra.mxu0 %v559_v10  ;;  %v388_v19 = vmul.f32 %v2625_v13, %v2625_v13  ;;  %v2645_v21 = vld [vmem:[%s2616_s21 + $0x20] sm:$0xff]  ;;  %v2648_v22 = vld [vmem:[%s2616_s21 + $0x28] sm:$0xff]  ;;  %2205 = vmatprep.subr.mxu1 %v561_v32  ;;  %s1960_s20 = sshll.u32 %s3699_s12, 4  ;;  %s3906_s20 = int_to_ptr.vmem [resolvable:$true] %s1960_s20 }
  0x21   : > { %596 = vmatprep.subr.mxu0 %v557_v11  ;;  %v390_v20 = vmul.f32 %v2635_v17, %v2635_v17  ;;  %v391_v23 = vmul.f32 %v2645_v21, %v2645_v21  ;;  %v392_v24 = vmul.f32 %v2648_v22, %v2648_v22  ;;  %v2655_v25 = vld [vmem:[%s2616_s21 + $0x30] sm:$0xff]  ;;  %v2658_v26 = vld [vmem:[%s2616_s21 + $0x38] sm:$0xff]  ;;  %v2665_v29 = vld [vmem:[%s2616_s21 + $0x40] sm:$0xff]  ;;  %2206 = vmatpush3.msra.mxu1 %v561_v32  ;;  %s2354_s26 = scalar_lea.vmem %s3906_s20, 2048 }
  0x22   : > { %403 = vadd.xlane.f32.xlu0 %v387_v15  ;;  %407 = vadd.xlane.f32.xlu1 %v389_v16  ;;  %v393_v27 = vmul.f32 %v2655_v25, %v2655_v25  ;;  %v394_v28 = vmul.f32 %v2658_v26, %v2658_v26  ;;  %v2668_v30 = vld [vmem:[%s2616_s21 + $0x48] sm:$0xff]  ;;  %v395_v36 = vmul.f32 %v2665_v29, %v2665_v29  ;;  %v2690_v38 = vld [vmem:[%s2616_s21 + $0x50] sm:$0xff]  ;;  %v2696_v40 = vld [vmem:[%s2616_s21 + $0x58] sm:$0xff]  ;;  %p2355_p11 = scmp.ne.s32.totalorder %s3906_s20, %s2354_s26 }
  0x23   : > { %597 = vmatpush1.msra.mxu0 %v556_v18  ;;  %v396_v37 = vmul.f32 %v2668_v30, %v2668_v30  ;;  %2207 = vmatprep.subr.mxu1 %v558_v35  ;;  %v547_v43 = vld [vmem:[%s4040_s2 + $0xc0] sm:$0xff]  ;;  %v545_v44 = vld [vmem:[%s4040_s2 + $0xb0] sm:$0xff]  ;;  %v552_v45 = vld [vmem:[%s4040_s2 + $0xe8] sm:$0xff]  ;;  %v397_v46 = vmul.f32 %v2690_v38, %v2690_v38  ;;  %v398_v47 = vmul.f32 %v2696_v40, %v2696_v40 }
  0x24   : > { %598 = vmatprep.subr.mxu0 %v554_v31  ;;  %2208 = vmatpush3.msra.mxu1 %v558_v35  ;;  %v544_v48 = vld [vmem:[%s4040_s2 + $0xa8] sm:$0xff]  ;;  %v2721_v49 = vld [vmem:[%s2616_s21 + $0x60] sm:$0xff]  ;;  %v542_v51 = vld [vmem:[%s4040_s2 + $0x98] sm:$0xff]  ;;  %p2356_p12 = pnand %p2355_p11, %p2566_p5 }
  0x25   : > { %599 = vmatpush1.msra.mxu0 %v553_v33  ;;  %2209 = vmatprep.subr.mxu1 %v555_v42  ;;  %v2724_v50 = vld [vmem:[%s2616_s21 + $0x68] sm:$0xff]  ;;  %v549_v52 = vld [vmem:[%s4040_s2 + $0xd0] sm:$0xff]  ;;  %v399_v54 = vmul.f32 %v2721_v49, %v2721_v49  ;;  %v539_v56 = vld [vmem:[%s4040_s2 + $0x80] sm:$0xff] }
  0x26   : > { %405 = vadd.xlane.f32.xlu0 %v388_v19  ;;  %409 = vadd.xlane.f32.xlu1 %v390_v20  ;;  %v541_v53 = vld [vmem:[%s4040_s2 + $0x90] sm:$0xff]  ;;  %v400_v55 = vmul.f32 %v2724_v50, %v2724_v50  ;;  %v546_v57 = vld [vmem:[%s4040_s2 + $0xb8] sm:$0xff]  ;;  %v536_v61 = vld [vmem:[%s4040_s2 + $0x68] sm:$0xff]  ;;  %v2472_v19 = vmov 0.0   ;;  %p2357_p13 = pneg %p2356_p12 }
  0x27   : > { %600 = vmatprep.subr.mxu0 %v551_v34  ;;  %2210 = vmatpush3.msra.mxu1 %v555_v42  ;;  %v2746_v58 = vld [vmem:[%s2616_s21 + $0x70] sm:$0xff]  ;;  %v2749_v59 = vld [vmem:[%s2616_s21 + $0x78] sm:$0xff]  ;;  %v543_v62 = vld [vmem:[%s4040_s2 + $0xa0] sm:$0xff]  ;;  %s2473_s21 = smov 64  }
  0x28   : > { %601 = vmatpush1.msra.mxu0 %v550_v39  ;;  %2211 = vmatprep.subr.mxu1 %v552_v45  ;;  %v538_v60 = vld [vmem:[%s4040_s2 + $0x78] sm:$0xff]  ;;  %v401_v63 = vmul.f32 %v2746_v58, %v2746_v58  ;;  %v402_v0 = vmul.f32 %v2749_v59, %v2749_v59  ;;  %v535_v1 = vld [vmem:[%s4040_s2 + $0x60] sm:$0xff]  ;;  %v533_v2 = vld [vmem:[%s4040_s2 + $0x50] sm:$0xff] }
  0x29   : > { %602 = vmatprep.subr.mxu0 %v548_v41  ;;  %2212 = vmatpush3.msra.mxu1 %v552_v45  ;;  %v540_v3 = vld [vmem:[%s4040_s2 + $0x88] sm:$0xff]  ;;  %v530_v5 = vld [vmem:[%s4040_s2 + $0x38] sm:$0xff]  ;;  %v537_v6 = vld [vmem:[%s4040_s2 + $0x70] sm:$0xff] }
  0x2a   : > { %411 = vadd.xlane.f32.xlu0 %v391_v23  ;;  %413 = vadd.xlane.f32.xlu1 %v392_v24  ;;  %v532_v4 = vld [vmem:[%s4040_s2 + $0x48] sm:$0xff]  ;;  %v529_v7 = vld [vmem:[%s4040_s2 + $0x30] sm:$0xff]  ;;  %v527_v8 = vld [vmem:[%s4040_s2 + $0x20] sm:$0xff] }
  0x2b   : > { %603 = vmatpush1.msra.mxu0 %v547_v43  ;;  %2213 = vmatprep.subr.mxu1 %v549_v52  ;;  %v534_v9 = vld [vmem:[%s4040_s2 + $0x58] sm:$0xff]  ;;  %v524_v11 = vld [vmem:[%s4040_s2 + $0x8] sm:$0xff]  ;;  %v531_v15 = vld [vmem:[%s4040_s2 + $0x40] sm:$0xff] }
  0x2c   : > { %604 = vmatprep.subr.mxu0 %v545_v44  ;;  %2214 = vmatpush3.msra.mxu1 %v549_v52  ;;  %v526_v10 = vld [vmem:[%s4040_s2 + $0x18] sm:$0xff]  ;;  %v523_v16 = vld [vmem:[%s4040_s2] sm:$0xff]  ;;  %v528_v18 = vld [vmem:[%s4040_s2 + $0x28] sm:$0xff] }
  0x2d   : > { %605 = vmatpush1.msra.mxu0 %v544_v48  ;;  %2215 = vmatprep.subr.mxu1 %v546_v57  ;;  %v525_v20 = vld [vmem:[%s4040_s2 + $0x10] sm:$0xff]  ;;  %v2817_v23 = vld [vmem:[%s2814_s24] sm:$0xff]  ;;  %v2822_v24 = vld [vmem:[%s2814_s24 + $0x8] sm:$0xff] }
  0x2e   : > { %415 = vadd.xlane.f32.xlu0 %v393_v27  ;;  %417 = vadd.xlane.f32.xlu1 %v394_v28  ;;  %v2827_v27 = vld [vmem:[%s2814_s24 + $0x10] sm:$0xff]  ;;  %v2830_v28 = vld [vmem:[%s2814_s24 + $0x18] sm:$0xff]  ;;  %v2837_v31 = vld [vmem:[%s2814_s24 + $0x20] sm:$0xff] }
  0x2f   : > { %606 = vmatprep.subr.mxu0 %v542_v51  ;;  %2216 = vmatpush3.msra.mxu1 %v546_v57  ;;  %v899_v32 = vld [vmem:[%s2814_s24 + $0x28] sm:$0xff]  ;;  %v900_v33 = vld [vmem:[%s2814_s24 + $0x30] sm:$0xff]  ;;  %v901_v34 = vld [vmem:[%s2814_s24 + $0x38] sm:$0xff] }
  0x30   : > { %607 = vmatpush1.msra.mxu0 %v541_v53  ;;  %2217 = vmatprep.subr.mxu1 %v543_v62  ;;  %v902_v35 = vld [vmem:[%s2814_s24 + $0x40] sm:$0xff]  ;;  %v905_v39 = vld [vmem:[%s2814_s24 + $0x58] sm:$0xff]  ;;  %v907_v42 = vld [vmem:[%s2814_s24 + $0x68] sm:$0xff] }
  0x31   : > { %608 = vmatprep.subr.mxu0 %v539_v56  ;;  %2218 = vmatpush3.msra.mxu1 %v543_v62  ;;  %v906_v41 = vld [vmem:[%s2814_s24 + $0x60] sm:$0xff]  ;;  %v908_v43 = vld [vmem:[%s2814_s24 + $0x70] sm:$0xff] }
  0x32   : > { %419 = vadd.xlane.f32.xlu0 %v395_v36  ;;  %421 = vadd.xlane.f32.xlu1 %v396_v37  ;;  %v903_v36 = vld [vmem:[%s2814_s24 + $0x48] sm:$0xff]  ;;  %v904_v37 = vld [vmem:[%s2814_s24 + $0x50] sm:$0xff] }
  0x33   : > { %609 = vmatpush1.msra.mxu0 %v538_v60  ;;  %2219 = vmatprep.subr.mxu1 %v540_v3 }
  0x34   : > { %610 = vmatprep.subr.mxu0 %v536_v61  ;;  %2220 = vmatpush3.msra.mxu1 %v540_v3 }
  0x35   : > { %611 = vmatpush1.msra.mxu0 %v535_v1  ;;  %2221 = vmatprep.subr.mxu1 %v537_v6 }
  0x36   : > { %423 = vadd.xlane.f32.xlu0 %v397_v46  ;;  %425 = vadd.xlane.f32.xlu1 %v398_v47 }
  0x37   : > { %612 = vmatprep.subr.mxu0 %v533_v2  ;;  %2222 = vmatpush3.msra.mxu1 %v537_v6 }
  0x38   : > { %613 = vmatpush1.msra.mxu0 %v532_v4  ;;  %2223 = vmatprep.subr.mxu1 %v534_v9 }
  0x39   : > { %614 = vmatprep.subr.mxu0 %v530_v5  ;;  %2224 = vmatpush3.msra.mxu1 %v534_v9 }
  0x3a   : > { %427 = vadd.xlane.f32.xlu0 %v399_v54  ;;  %429 = vadd.xlane.f32.xlu1 %v400_v55 }
  0x3b   : > { %615 = vmatpush1.msra.mxu0 %v529_v7  ;;  %2225 = vmatprep.subr.mxu1 %v531_v15 }
  0x3c   : > { %616 = vmatprep.subr.mxu0 %v527_v8  ;;  %652 = vmatprep.mubr.f32.mxu0 %v2472_v19 }
  0x3d   : > { %617 = vmatpush1.msra.mxu0 %v526_v10  ;;  %2226 = vmatpush3.msra.mxu1 %v531_v15 }
  0x3e   : > { %431 = vadd.xlane.f32.xlu0 %v401_v63  ;;  %433 = vadd.xlane.f32.xlu1 %v402_v0 }
  0x3f   : > { %618 = vmatprep.subr.mxu0 %v524_v11  ;;  %2227 = vmatprep.subr.mxu1 %v528_v18 }
  0x40   : > { %619 = vmatpush1.msra.mxu0 %v523_v16  ;;  %2228 = vmatpush3.msra.mxu1 %v528_v18  ;;  %v2864_v16 = vld [vmem:[%s4114_s1] ss:$0 sm:$0xff] }
  0x41   : > { %2229 = vmatprep.subr.mxu1 %v525_v20 }
  0x42   : > { %2230 = vmatpush3.msra.mxu1 %v525_v20 }
  0x4f   : > { %1265 = vrot.lane.b32.xlu1 %v2822_v24, %s2473_s21 }
  0x53   : > { %1269 = vrot.lane.b32.xlu1 %v2830_v28, %s2473_s21 }
  0x54   : > { %1263 = vrot.lane.b32.xlu0 %v2817_v23, %s2473_s21 }
  0x57   : > { %1273 = vrot.lane.b32.xlu1 %v899_v32, %s2473_s21 }
  0x58   : > { %1267 = vrot.lane.b32.xlu0 %v2827_v27, %s2473_s21 }
  0x5b   : > { %1277 = vrot.lane.b32.xlu1 %v901_v34, %s2473_s21 }
  0x5c   : > { %1271 = vrot.lane.b32.xlu0 %v2837_v31, %s2473_s21 }
  0x5f   : > { %1281 = vrot.lane.b32.xlu1 %v903_v36, %s2473_s21 }
  0x60   : > { %1275 = vrot.lane.b32.xlu0 %v900_v33, %s2473_s21 }
  0x63   : > { %1285 = vrot.lane.b32.xlu1 %v905_v39, %s2473_s21 }
  0x64   : > { %1279 = vrot.lane.b32.xlu0 %v902_v35, %s2473_s21 }
  0x67   : > { %1289 = vrot.lane.b32.xlu1 %v907_v42, %s2473_s21 }
  0x68   : > { %1283 = vrot.lane.b32.xlu0 %v904_v37, %s2473_s21 }
  0x6c   : > { %1287 = vrot.lane.b32.xlu0 %v906_v41, %s2473_s21 }
  0x70   : > { %1291 = vrot.lane.b32.xlu0 %v908_v43, %s2473_s21 }
  0xab   : > { %v404_v44 = vpop.xlane.xlu0 %403  ;;  %v408_v45 = vpop.xlane.xlu1 %407 }
  0xac   : > { %v436_v46 = vmul.f32 0.0078125, %v404_v44  ;;  %v438_v47 = vmul.f32 0.0078125, %v408_v45 }
  0xae   : > { %v452_v48 = vadd.f32 1e-06, %v436_v46  ;;  %v454_v51 = vadd.f32 1e-06, %v438_v47 }
  0xaf   : > { %v406_v52 = vpop.xlane.xlu0 %405  ;;  %v410_v53 = vpop.xlane.xlu1 %409 }
  0xb0   : > { %2310 = vrsqrt.f32 %v452_v48  ;;  %v437_v54 = vmul.f32 0.0078125, %v406_v52  ;;  %v439_v55 = vmul.f32 0.0078125, %v410_v53 }
  0xb1   : > { %2312 = vrsqrt.f32 %v454_v51 }
  0xb2   : > { %v453_v56 = vadd.f32 1e-06, %v437_v54  ;;  %v455_v57 = vadd.f32 1e-06, %v439_v55 }
  0xb3   : > { %v412_v60 = vpop.xlane.xlu0 %411  ;;  %v414_v61 = vpop.xlane.xlu1 %413 }
  0xb4   : > { %2314 = vrsqrt.f32 %v453_v56  ;;  %v440_v62 = vmul.f32 0.0078125, %v412_v60  ;;  %v441_v63 = vmul.f32 0.0078125, %v414_v61 }
  0xb5   : > { %2316 = vrsqrt.f32 %v455_v57 }
  0xb6   : > { %v456_v0 = vadd.f32 1e-06, %v440_v62  ;;  %v457_v1 = vadd.f32 1e-06, %v441_v63 }
  0xb7   : > { %v416_v2 = vpop.xlane.xlu0 %415  ;;  %v418_v3 = vpop.xlane.xlu1 %417 }
  0xb8   : > { %2318 = vrsqrt.f32 %v456_v0  ;;  %v442_v4 = vmul.f32 0.0078125, %v416_v2  ;;  %v443_v5 = vmul.f32 0.0078125, %v418_v3 }
  0xb9   : > { %2320 = vrsqrt.f32 %v457_v1 }
  0xba   : > { %v458_v6 = vadd.f32 1e-06, %v442_v4  ;;  %v459_v7 = vadd.f32 1e-06, %v443_v5 }
  0xbb   : > { %v420_v8 = vpop.xlane.xlu0 %419  ;;  %v422_v9 = vpop.xlane.xlu1 %421 }
  0xbc   : > { %2322 = vrsqrt.f32 %v458_v6  ;;  %v444_v10 = vmul.f32 0.0078125, %v420_v8  ;;  %v445_v11 = vmul.f32 0.0078125, %v422_v9 }
  0xbd   : > { %v2311_v15 = vpop.eup %2310  ;;  %2324 = vrsqrt.f32 %v459_v7 }
  0xbe   : > { %v2313_v18 = vpop.eup %2312  ;;  %v484_v20 = vmul.f32 %v2311_v15, %v2622_v12  ;;  %v460_v32 = vadd.f32 1e-06, %v444_v10  ;;  %v461_v33 = vadd.f32 1e-06, %v445_v11 }
  0xbf   : > { %v424_v34 = vpop.xlane.xlu0 %423  ;;  %v426_v35 = vpop.xlane.xlu1 %425  ;;  %v486_v42 = vmul.f32 %v2313_v18, %v2628_v14 }
  0xc0   : > { %v507_v36 = vmul.f32 %v2864_v16, %v484_v20  ;;  %2326 = vrsqrt.f32 %v460_v32  ;;  %v446_v37 = vmul.f32 0.0078125, %v424_v34  ;;  %v447_v39 = vmul.f32 0.0078125, %v426_v35 }
  0xc1   : > { %v2315_v41 = vpop.eup %2314  ;;  %2328 = vrsqrt.f32 %v461_v33  ;;  %v509_v54 = vmul.f32 %v2864_v16, %v486_v42 }
  0xc2   : > { %v2317_v43 = vpop.eup %2316  ;;  %653 = vmatmul.mubr.f32.vlgmr.msra.gmra.mxu0 %v507_v36  ;;  %2231 = vmatprep.mubr.f32.mxu1 %v507_v36  ;;  %v485_v44 = vmul.f32 %v2315_v41, %v2625_v13  ;;  %v462_v45 = vadd.f32 1e-06, %v446_v37  ;;  %v463_v12 = vadd.f32 1e-06, %v447_v39 }
  0xc3   : > { %658 = vmatprep.mubr.f32.mxu0 %v2472_v19  ;;  %v487_v46 = vmul.f32 %v2317_v43, %v2635_v17  ;;  %v428_v47 = vpop.xlane.xlu0 %427  ;;  %v430_v48 = vpop.xlane.xlu1 %429 }
  0xc4   : > { %v508_v51 = vmul.f32 %v2864_v16, %v485_v44  ;;  %2330 = vrsqrt.f32 %v462_v45  ;;  %v448_v52 = vmul.f32 0.0078125, %v428_v47  ;;  %v449_v53 = vmul.f32 0.0078125, %v430_v48  ;;  %v571_v45 = vld [vmem:[%s4041_s3] sm:$0x7] }
  0xc5   : > { %v2319_v14 = vpop.eup %2318  ;;  %2332 = vrsqrt.f32 %v463_v12  ;;  %v510_v13 = vmul.f32 %v2864_v16, %v487_v46 }
  0xc6   : > { %v2321_v55 = vpop.eup %2320  ;;  %659 = vmatmul.mubr.f32.gmra.mxu0 %v508_v51  ;;  %2232 = vmatmul.mubr.f32.vlgmr.msra.gmra.mxu1 %v508_v51  ;;  %v488_v56 = vmul.f32 %v2319_v14, %v2645_v21  ;;  %v464_v57 = vadd.f32 1e-06, %v448_v52  ;;  %v465_v17 = vadd.f32 1e-06, %v449_v53 }
  0xc7   : > { %664 = vmatprep.mubr.f32.mxu0 %v2472_v19  ;;  %2234 = vmatprep.mubr.f32.mxu1 %v509_v54  ;;  %v489_v60 = vmul.f32 %v2321_v55, %v2648_v22  ;;  %v432_v61 = vpop.xlane.xlu0 %431  ;;  %v434_v62 = vpop.xlane.xlu1 %433 }
  0xc8   : > { %2334 = vrsqrt.f32 %v464_v57  ;;  %v450_v63 = vmul.f32 0.0078125, %v432_v61  ;;  %v451_v0 = vmul.f32 0.0078125, %v434_v62  ;;  %v511_v2 = vmul.f32 %v2864_v16, %v488_v56 }
  0xc9   : > { %v2323_v1 = vpop.eup %2322  ;;  %2336 = vrsqrt.f32 %v465_v17  ;;  %v512_v21 = vmul.f32 %v2864_v16, %v489_v60 }
  0xca   : > { %v2325_v3 = vpop.eup %2324  ;;  %665 = vmatmul.mubr.f32.gmra.mxu0 %v509_v54  ;;  %2235 = vmatmul.mubr.f32.gmra.mxu1 %v510_v13  ;;  %v490_v4 = vmul.f32 %v2323_v1, %v2655_v25  ;;  %v466_v5 = vadd.f32 1e-06, %v450_v63  ;;  %v467_v6 = vadd.f32 1e-06, %v451_v0 }
  0xcb   : > { %670 = vmatprep.mubr.f32.mxu0 %v2472_v19  ;;  %2237 = vmatprep.mubr.f32.mxu1 %v511_v2  ;;  %v491_v22 = vmul.f32 %v2325_v3, %v2658_v26 }
  0xcc   : > { %2338 = vrsqrt.f32 %v466_v5  ;;  %v513_v8 = vmul.f32 %v2864_v16, %v490_v4 }
  0xcd   : > { %v2327_v7 = vpop.eup %2326  ;;  %2340 = vrsqrt.f32 %v467_v6  ;;  %v514_v25 = vmul.f32 %v2864_v16, %v491_v22 }
  0xce   : > { %v2329_v9 = vpop.eup %2328  ;;  %671 = vmatmul.mubr.f32.gmra.mxu0 %v510_v13  ;;  %2238 = vmatmul.mubr.f32.gmra.mxu1 %v512_v21  ;;  %v492_v10 = vmul.f32 %v2327_v7, %v2665_v29 }
  0xcf   : > { %676 = vmatprep.mubr.f32.mxu0 %v2472_v19  ;;  %2240 = vmatprep.mubr.f32.mxu1 %v513_v8  ;;  %v493_v11 = vmul.f32 %v2329_v9, %v2668_v30 }
  0xd0   : > { %v515_v26 = vmul.f32 %v2864_v16, %v492_v10 }
  0xd1   : > { %v2331_v15 = vpop.eup %2330  ;;  %v516_v29 = vmul.f32 %v2864_v16, %v493_v11 }
  0xd2   : > { %v2333_v18 = vpop.eup %2332  ;;  %677 = vmatmul.mubr.f32.gmra.mxu0 %v511_v2  ;;  %v494_v20 = vmul.f32 %v2331_v15, %v2690_v38  ;;  %2241 = vmatmul.mubr.f32.gmra.mxu1 %v514_v25 }
  0xd3   : > { %682 = vmatprep.mubr.f32.mxu0 %v2472_v19  ;;  %2243 = vmatprep.mubr.f32.mxu1 %v515_v26  ;;  %v495_v32 = vmul.f32 %v2333_v18, %v2696_v40 }
  0xd4   : > { %v517_v34 = vmul.f32 %v2864_v16, %v494_v20 }
  0xd5   : > { %v2335_v33 = vpop.eup %2334  ;;  %v518_v38 = vmul.f32 %v2864_v16, %v495_v32 }
  0xd6   : > { %v2337_v35 = vpop.eup %2336  ;;  %683 = vmatmul.mubr.f32.gmra.mxu0 %v512_v21  ;;  %v496_v30 = vmul.f32 %v2335_v33, %v2721_v49  ;;  %2244 = vmatmul.mubr.f32.gmra.mxu1 %v516_v29 }
  0xd7   : > { %688 = vmatprep.mubr.f32.mxu0 %v2472_v19  ;;  %2246 = vmatprep.mubr.f32.mxu1 %v517_v34  ;;  %v497_v36 = vmul.f32 %v2337_v35, %v2724_v50 }
  0xd8   : > { %v519_v39 = vmul.f32 %v2864_v16, %v496_v30 }
  0xd9   : > { %v2339_v37 = vpop.eup %2338  ;;  %v520_v49 = vmul.f32 %v2864_v16, %v497_v36 }
  0xda   : > { %v2341_v41 = vpop.eup %2340  ;;  %689 = vmatmul.mubr.f32.gmra.mxu0 %v513_v8  ;;  %v498_v40 = vmul.f32 %v2339_v37, %v2746_v58  ;;  %2247 = vmatmul.mubr.f32.gmra.mxu1 %v518_v38  ;;  %v909_v58 = vld [vmem:[%s2814_s24 + $0x78] sm:$0xff] }
  0xdb   : > { %694 = vmatprep.mubr.f32.mxu0 %v2472_v19  ;;  %2249 = vmatprep.mubr.f32.mxu1 %v519_v39  ;;  %v499_v42 = vmul.f32 %v2341_v41, %v2749_v59  ;;  %v573_v59 = vlaneseq }
  0xdc   : > { %v521_v43 = vmul.f32 %v2864_v16, %v498_v40  ;;  %1293 = vrot.lane.b32.xlu1 %v909_v58, %s2473_s21 }
  0xdd   : > { %v522_v50 = vmul.f32 %v2864_v16, %v499_v42  ;;  %v574_v16 = vshrl.u32 %v573_v59, 7 }
  0xde   : > { %695 = vmatmul.mubr.f32.gmra.mxu0 %v514_v25  ;;  %2250 = vmatmul.mubr.f32.gmra.mxu1 %v520_v49 }
  0xdf   : > { %700 = vmatprep.mubr.f32.mxu0 %v2472_v19  ;;  %2252 = vmatprep.mubr.f32.mxu1 %v521_v43  ;;  %v575_v44 = vsub.s32 0, %v574_v16  ;;  %v583_v46 = vsub.s32 2, %v574_v16  ;;  %v579_v57 = vsub.s32 1, %v574_v16 }
  0xe1   : > { %v2918_v12 = vrot.slane %v571_v45, %v575_v44  ;;  %v2953_v0 = vrot.slane %v571_v45, %v579_v57 }
  0xe2   : > { %701 = vmatmul.mubr.f32.gmra.mxu0 %v515_v26  ;;  %2253 = vmatmul.mubr.f32.gmra.mxu1 %v522_v50 }
  0xe3   : > { %706 = vmatprep.mubr.f32.mxu0 %v2472_v19 }
  0xe6   : > { %707 = vmatmul.mubr.f32.gmra.mxu0 %v516_v29 }
  0xe7   : > { %712 = vmatprep.mubr.f32.mxu0 %v2472_v19 }
  0xea   : > { %713 = vmatmul.mubr.f32.gmra.mxu0 %v517_v34 }
  0xeb   : > { %718 = vmatprep.mubr.f32.mxu0 %v2472_v19 }
  0xee   : > { %719 = vmatmul.mubr.f32.gmra.mxu0 %v518_v38 }
  0xef   : > { %724 = vmatprep.mubr.f32.mxu0 %v2472_v19 }
  0xf2   : > { %725 = vmatmul.mubr.f32.gmra.mxu0 %v519_v39 }
  0xf3   : > { %730 = vmatprep.mubr.f32.mxu0 %v2472_v19 }
  0xf6   : > { %731 = vmatmul.mubr.f32.gmra.mxu0 %v520_v49 }
  0xf7   : > { %736 = vmatprep.mubr.f32.mxu0 %v2472_v19 }
  0xfa   : > { %737 = vmatmul.mubr.f32.gmra.mxu0 %v521_v43 }
  0xfb   : > { %742 = vmatprep.mubr.f32.mxu0 %v2472_v19  ;;  %v2928_v19 = vrot.slane %v571_v45, %v583_v46 }
  0xfe   : > { %743 = vmatmul.mubr.f32.gmra.mxu0 %v522_v50 }
 0x182   : > { %v654_v47 = vpop.f32.mrf.mxu0 }
 0x183   : > { %v2922_v48 = vadd.f32 %v654_v47, %v2918_v12 }
 0x184   : > { %v656_v51 = vpop.f32.mrf.mxu0 }
 0x185   : > { %1022 = vrot.lane.b32.xlu0 %v2922_v48, %s2474_s22  ;;  %v926_v17 = vsub.f32 0.0, %v2922_v48  ;;  %v2963_v5 = vadd.f32 %v656_v51, %v2953_v0 }
 0x186   : > { %v660_v52 = vpop.f32.mrf.mxu0  ;;  %v2233_v53 = vpop.f32.mrf.mxu1 }
 0x187   : > { %v2933_v14 = vadd.f32 %v660_v52, %v2918_v12  ;;  %v821_v54 = vadd.f32 %v2233_v53, %v2928_v19  ;;  %v1456_v26 = vsub.f32 0.0, %v2963_v5  ;;  %v3050_v53 = vpop.permute.xlu0 %1263 }
 0x188   : > { %v815_v55 = vpop.f32.mrf.mxu1  ;;  %v662_v22 = vpop.f32.mrf.mxu0 }
 0x189   : > { %1921 = vst [vmem:[%s2937_s17 + $0x8] sm:$0xff] %v821_v54  ;;  %v816_v13 = vadd.f32 %v815_v55, %v2928_v19  ;;  %1183 = vrot.lane.b32.xlu0 %v2922_v48, %s2475_s23  ;;  %1024 = vrot.lane.b32.xlu1 %v2933_v14, %s2474_s22  ;;  %v927_v1 = vsub.f32 0.0, %v2933_v14  ;;  %v2973_v10 = vadd.f32 %v662_v22, %v2953_v0  ;;  %v3060_v55 = vpop.permute.xlu1 %1265 }
 0x18a   : > { %v2236_v56 = vpop.f32.mrf.mxu1  ;;  %v666_v18 = vpop.f32.mrf.mxu0 }
 0x18b   : > { %1920 = vst [vmem:[%s2937_s17] sm:$0xff] %v816_v13  ;;  %v831_v60 = vadd.f32 %v2236_v56, %v2928_v19  ;;  %v1457_v20 = vsub.f32 0.0, %v2973_v10  ;;  %v2992_v29 = vadd.f32 %v666_v18, %v2918_v12  ;;  %v3062_v13 = vpop.permute.xlu0 %1267 }
 0x18c   : > { %v825_v61 = vpop.f32.mrf.mxu1  ;;  %v668_v33 = vpop.f32.mrf.mxu0 }
 0x18d   : > { %958 = vrot.lane.b32.xlu0 %v926_v17, %s2475_s23  ;;  %1185 = vrot.lane.b32.xlu1 %v2933_v14, %s2475_s23  ;;  %1923 = vst [vmem:[%s2937_s17 + $0x18] sm:$0xff] %v831_v60  ;;  %v826_v62 = vadd.f32 %v825_v61, %v2928_v19  ;;  %v928_v32 = vsub.f32 0.0, %v2992_v29  ;;  %v3012_v39 = vadd.f32 %v668_v33, %v2953_v0  ;;  %v3069_v57 = vpop.permute.xlu1 %1269 }
 0x18e   : > { %v2239_v63 = vpop.f32.mrf.mxu1  ;;  %v672_v34 = vpop.f32.mrf.mxu0  ;;  %4120 = vst [vmem:[#allocation14_spill] sm:$0xff] %v3069_v57  ;;  %v2343_v57 = vld [vmem:[%s2814_s24 + $0x20] sm:$0xff] }
 0x18f   : > { %1922 = vst [vmem:[%s2937_s17 + $0x10] sm:$0xff] %v826_v62  ;;  %v841_v2 = vadd.f32 %v2239_v63, %v2928_v19  ;;  %v2999_v30 = vadd.f32 %v672_v34, %v2918_v12  ;;  %v1458_v40 = vsub.f32 0.0, %v3012_v39 }
 0x190   : > { %v835_v3 = vpop.f32.mrf.mxu1  ;;  %v674_v49 = vpop.f32.mrf.mxu0 }
 0x191   : > { %1135 = vrot.lane.b32.xlu0 %v926_v17, %s2474_s22  ;;  %960 = vrot.lane.b32.xlu1 %v927_v1, %s2475_s23  ;;  %1925 = vst [vmem:[%s2937_s17 + $0x28] sm:$0xff] %v841_v2  ;;  %v836_v21 = vadd.f32 %v835_v3, %v2928_v19  ;;  %4115 = vst [vmem:[#allocation9_spill] sm:$0xff] %v2999_v30  ;;  %v929_v41 = vsub.f32 0.0, %v2999_v30  ;;  %v3026_v43 = vadd.f32 %v674_v49, %v2953_v0  ;;  %v3071_v17 = vpop.permute.xlu0 %1271  ;;  %v3077_v62 = vpop.permute.xlu1 %1273 }
 0x192   : > { %v2242_v4 = vpop.f32.mrf.mxu1  ;;  %v678_v42 = vpop.f32.mrf.mxu0  ;;  %4121 = vst [vmem:[#allocation15_spill] sm:$0xff] %v3071_v17  ;;  %4122 = vst [vmem:[#allocation16_spill] sm:$0xff] %v3077_v62  ;;  %v3363_v62 = vld [vmem:[%s2814_s24 + $0x28] sm:$0xff] }
 0x193   : > { %1924 = vst [vmem:[%s2937_s17 + $0x20] sm:$0xff] %v836_v21  ;;  %v851_v6 = vadd.f32 %v2242_v4, %v2928_v19  ;;  %4116 = vst [vmem:[#allocation10_spill] sm:$0xff] %v3026_v43  ;;  %v3032_v50 = vadd.f32 %v678_v42, %v2918_v12  ;;  %v1459_v58 = vsub.f32 0.0, %v3026_v43 }
 0x194   : > { %v845_v7 = vpop.f32.mrf.mxu1  ;;  %v680_v59 = vpop.f32.mrf.mxu0  ;;  %4151 = vst [vmem:[#allocation45_spill] sm:$0xff] %v3363_v62 }
 0x195   : > { %1552 = vrot.lane.b32.xlu0 %v2963_v5, %s2474_s22  ;;  %1137 = vrot.lane.b32.xlu1 %v927_v1, %s2474_s22  ;;  %1927 = vst [vmem:[%s2937_s17 + $0x38] sm:$0xff] %v851_v6  ;;  %v846_v8 = vadd.f32 %v845_v7, %v2928_v19  ;;  %4117 = vst [vmem:[#allocation11_spill] sm:$0xff] %v3032_v50  ;;  %v930_v16 = vsub.f32 0.0, %v3032_v50  ;;  %v3058_v54 = vadd.f32 %v680_v59, %v2953_v0  ;;  %v3081_v63 = vpop.permute.xlu0 %1275  ;;  %v3092_v21 = vpop.permute.xlu1 %1277 }
 0x196   : > { %v2245_v9 = vpop.f32.mrf.mxu1  ;;  %v684_v44 = vpop.f32.mrf.mxu0  ;;  %4123 = vst [vmem:[#allocation17_spill] sm:$0xff] %v3081_v63  ;;  %4126 = vst [vmem:[#allocation20_spill] sm:$0xff] %v3092_v21 }
 0x197   : > { %1926 = vst [vmem:[%s2937_s17 + $0x30] sm:$0xff] %v846_v8  ;;  %v861_v25 = vadd.f32 %v2245_v9, %v2928_v19  ;;  %v3044_v46 = vadd.f32 %v684_v44, %v2918_v12  ;;  %4119 = vst [vmem:[#allocation13_spill] sm:$0xff] %v3058_v54  ;;  %v1460_v60 = vsub.f32 0.0, %v3058_v54 }
 0x198   : > { %v855_v11 = vpop.f32.mrf.mxu1  ;;  %v686_v61 = vpop.f32.mrf.mxu0 }
 0x199   : > { %1712 = vrot.lane.b32.xlu0 %v2963_v5, %s2475_s23  ;;  %1554 = vrot.lane.b32.xlu1 %v2973_v10, %s2474_s22  ;;  %1929 = vst [vmem:[%s2937_s17 + $0x48] sm:$0xff] %v861_v25  ;;  %v856_v15 = vadd.f32 %v855_v11, %v2928_v19  ;;  %4118 = vst [vmem:[#allocation12_spill] sm:$0xff] %v3044_v46  ;;  %v931_v56 = vsub.f32 0.0, %v3044_v46  ;;  %v3084_v1 = vadd.f32 %v686_v61, %v2953_v0  ;;  %v3094_v4 = vpop.permute.xlu0 %1279  ;;  %v3101_v22 = vpop.permute.xlu1 %1281 }
 0x19a   : > { %v2248_v35 = vpop.f32.mrf.mxu1  ;;  %v690_v2 = vpop.f32.mrf.mxu0  ;;  %4127 = vst [vmem:[#allocation21_spill] sm:$0xff] %v3094_v4  ;;  %4128 = vst [vmem:[#allocation22_spill] sm:$0xff] %v3101_v22  ;;  %v3322_v4 = vld [vmem:[%s3149_s13 + $0x20] sm:$0xff] }
 0x19b   : > { %1928 = vst [vmem:[%s2937_s17 + $0x40] sm:$0xff] %v856_v15  ;;  %v871_v36 = vadd.f32 %v2248_v35, %v2928_v19  ;;  %4124 = vst [vmem:[#allocation18_spill] sm:$0xff] %v3084_v1  ;;  %v3087_v3 = vadd.f32 %v690_v2, %v2918_v12  ;;  %v1461_v6 = vsub.f32 0.0, %v3084_v1 }
 0x19c   : > { %v865_v38 = vpop.f32.mrf.mxu1  ;;  %v692_v9 = vpop.f32.mrf.mxu0 }
 0x19d   : > { %1488 = vrot.lane.b32.xlu0 %v1456_v26, %s2475_s23  ;;  %1714 = vrot.lane.b32.xlu1 %v2973_v10, %s2475_s23  ;;  %v866_v37 = vadd.f32 %v865_v38, %v2928_v19  ;;  %1931 = vst [vmem:[%s2937_s17 + $0x58] sm:$0xff] %v871_v36  ;;  %4125 = vst [vmem:[#allocation19_spill] sm:$0xff] %v3087_v3  ;;  %v932_v7 = vsub.f32 0.0, %v3087_v3  ;;  %v3107_v8 = vpop.permute.xlu0 %1283  ;;  %v3111_v11 = vpop.permute.xlu1 %1285  ;;  %v3126_v34 = vadd.f32 %v692_v9, %v2953_v0 }
 0x19e   : > { %v2251_v45 = vpop.f32.mrf.mxu1  ;;  %4129 = vst [vmem:[#allocation23_spill] sm:$0xff] %v3107_v8  ;;  %4130 = vst [vmem:[#allocation24_spill] sm:$0xff] %v3111_v11  ;;  %v696_v15 = vpop.f32.mrf.mxu0 }
 0x19f   : > { %1930 = vst [vmem:[%s2937_s17 + $0x50] sm:$0xff] %v866_v37  ;;  %v881_v51 = vadd.f32 %v2251_v45, %v2928_v19  ;;  %v3114_v18 = vadd.f32 %v696_v15, %v2918_v12  ;;  %4133 = vst [vmem:[#allocation27_spill] sm:$0xff] %v3126_v34 }
 0x1a0   : > { %v875_v47 = vpop.f32.mrf.mxu1 }
 0x1a1   : > { %1664 = vrot.lane.b32.xlu0 %v1456_v26, %s2474_s22  ;;  %1490 = vrot.lane.b32.xlu1 %v1457_v20, %s2475_s23  ;;  %v876_v52 = vadd.f32 %v875_v47, %v2928_v19  ;;  %1933 = vst [vmem:[%s2937_s17 + $0x68] sm:$0xff] %v881_v51  ;;  %4131 = vst [vmem:[#allocation25_spill] sm:$0xff] %v3114_v18  ;;  %v3128_v35 = vpop.permute.xlu1 %1289  ;;  %v933_v38 = vsub.f32 0.0, %v3114_v18 }
 0x1a2   : > { %v2254_v25 = vpop.f32.mrf.mxu1  ;;  %4134 = vst [vmem:[#allocation28_spill] sm:$0xff] %v3128_v35 }
 0x1a3   : > { %1932 = vst [vmem:[%s2937_s17 + $0x60] sm:$0xff] %v876_v52  ;;  %v1087_v52 = vmul.f32 %v2817_v23, %v2922_v48 }
 0x1a4   : > { %v885_v26 = vpop.f32.mrf.mxu1 }
 0x1a5   : > { %1026 = vrot.lane.b32.xlu0 %v2992_v29, %s2474_s22  ;;  %1666 = vrot.lane.b32.xlu1 %v1457_v20, %s2474_s22  ;;  %v3116_v20 = vpop.permute.xlu0 %1287  ;;  %v886_v33 = vadd.f32 %v885_v26, %v2928_v19  ;;  %v3140_v36 = vpop.permute.xlu1 %1293 }
 0x1a6   : > { %4132 = vst [vmem:[#allocation26_spill] sm:$0xff] %v3116_v20  ;;  %4136 = vst [vmem:[#allocation30_spill] sm:$0xff] %v3140_v36 }
 0x1a7   : > { %1934 = vst [vmem:[%s2937_s17 + $0x70] sm:$0xff] %v886_v33 }
 0x1a9   : > { %1187 = vrot.lane.b32.xlu0 %v2992_v29, %s2475_s23  ;;  %962 = vrot.lane.b32.xlu1 %v928_v32, %s2475_s23 }
 0x1ad   : > { %1139 = vrot.lane.b32.xlu0 %v928_v32, %s2474_s22  ;;  %1028 = vrot.lane.b32.xlu1 %v2999_v30, %s2474_s22  ;;  %v891_v32 = vadd.f32 %v2254_v25, %v2928_v19  ;;  %v3134_v19 = vpop.permute.xlu0 %1291  ;;  %v1088_v25 = vmul.f32 %v2822_v24, %v2933_v14 }
 0x1ae   : > { %4135 = vst [vmem:[#allocation29_spill] sm:$0xff] %v3134_v19 }
 0x1af   : > { %1935 = vst [vmem:[%s2937_s17 + $0x78] sm:$0xff] %v891_v32 }
 0x1b1   : > { %1716 = vrot.lane.b32.xlu0 %v3012_v39, %s2475_s23  ;;  %1189 = vrot.lane.b32.xlu1 %v2999_v30, %s2475_s23 }
 0x1b5   : > { %1556 = vrot.lane.b32.xlu0 %v3012_v39, %s2474_s22  ;;  %964 = vrot.lane.b32.xlu1 %v929_v41, %s2475_s23 }
 0x1b9   : > { %1492 = vrot.lane.b32.xlu0 %v1458_v40, %s2475_s23  ;;  %1141 = vrot.lane.b32.xlu1 %v929_v41, %s2474_s22  ;;  %v1462_v41 = vsub.f32 0.0, %v3126_v34 }
 0x1bd   : > { %1668 = vrot.lane.b32.xlu0 %v1458_v40, %s2474_s22  ;;  %1718 = vrot.lane.b32.xlu1 %v3026_v43, %s2475_s23  ;;  %v698_v40 = vpop.f32.mrf.mxu0 }
 0x1be   : > { %v3152_v49 = vadd.f32 %v698_v40, %v2953_v0 }
 0x1bf   : > { %v702_v59 = vpop.f32.mrf.mxu0 }
 0x1c0   : > { %4137 = vst [vmem:[#allocation31_spill] sm:$0xff] %v3152_v49  ;;  %v3163_v44 = vadd.f32 %v702_v59, %v2918_v12 }
 0x1c1   : > { %1558 = vrot.lane.b32.xlu1 %v3026_v43, %s2474_s22  ;;  %1030 = vrot.lane.b32.xlu0 %v3032_v50, %s2474_s22  ;;  %v704_v32 = vpop.f32.mrf.mxu0 }
 0x1c2   : > { %4138 = vst [vmem:[#allocation32_spill] sm:$0xff] %v3163_v44  ;;  %v934_v26 = vsub.f32 0.0, %v3163_v44 }
 0x1c5   : > { %1494 = vrot.lane.b32.xlu1 %v1459_v58, %s2475_s23  ;;  %1191 = vrot.lane.b32.xlu0 %v3032_v50, %s2475_s23 }
 0x1c9   : > { %1670 = vrot.lane.b32.xlu1 %v1459_v58, %s2474_s22  ;;  %966 = vrot.lane.b32.xlu0 %v930_v16, %s2475_s23 }
 0x1cd   : > { %1032 = vrot.lane.b32.xlu1 %v3044_v46, %s2474_s22  ;;  %1143 = vrot.lane.b32.xlu0 %v930_v16, %s2474_s22  ;;  %v3160_v16 = vld [vmem:[%s3149_s13] sm:$0xff] }
 0x1d1   : > { %1193 = vrot.lane.b32.xlu1 %v3044_v46, %s2475_s23  ;;  %1720 = vrot.lane.b32.xlu0 %v3058_v54, %s2475_s23 }
 0x1d5   : > { %968 = vrot.lane.b32.xlu1 %v931_v56, %s2475_s23  ;;  %1560 = vrot.lane.b32.xlu0 %v3058_v54, %s2474_s22 }
 0x1d9   : > { %1145 = vrot.lane.b32.xlu1 %v931_v56, %s2474_s22  ;;  %1496 = vrot.lane.b32.xlu0 %v1460_v60, %s2475_s23 }
 0x1dd   : > { %1722 = vrot.lane.b32.xlu1 %v3084_v1, %s2475_s23  ;;  %1672 = vrot.lane.b32.xlu0 %v1460_v60, %s2474_s22  ;;  %v3176_v60 = vld [vmem:[%s3149_s13 + $0x8] sm:$0xff] }
 0x1e1   : > { %1562 = vrot.lane.b32.xlu1 %v3084_v1, %s2474_s22  ;;  %1034 = vrot.lane.b32.xlu0 %v3087_v3, %s2474_s22 }
 0x1e5   : > { %1498 = vrot.lane.b32.xlu1 %v1461_v6, %s2475_s23  ;;  %1195 = vrot.lane.b32.xlu0 %v3087_v3, %s2475_s23 }
 0x1e9   : > { %1674 = vrot.lane.b32.xlu1 %v1461_v6, %s2474_s22  ;;  %970 = vrot.lane.b32.xlu0 %v932_v7, %s2475_s23 }
 0x1ed   : > { %1036 = vrot.lane.b32.xlu1 %v3114_v18, %s2474_s22  ;;  %1147 = vrot.lane.b32.xlu0 %v932_v7, %s2474_s22  ;;  %v1463_v7 = vsub.f32 0.0, %v3152_v49 }
 0x1f1   : > { %1197 = vrot.lane.b32.xlu1 %v3114_v18, %s2475_s23  ;;  %1724 = vrot.lane.b32.xlu0 %v3126_v34, %s2475_s23 }
 0x1f5   : > { %972 = vrot.lane.b32.xlu1 %v933_v38, %s2475_s23  ;;  %1564 = vrot.lane.b32.xlu0 %v3126_v34, %s2474_s22 }
 0x1f7   : > { %v1023_v37 = vpop.permute.xlu0 %1022 }
 0x1f9   : > { %1149 = vrot.lane.b32.xlu1 %v933_v38, %s2474_s22  ;;  %1500 = vrot.lane.b32.xlu0 %v1462_v41, %s2475_s23 }
 0x1fb   : > { %v1025_v42 = vpop.permute.xlu1 %1024  ;;  %v3154_v58 = vpop.permute.xlu0 %1183 }
 0x1fd   : > { %1726 = vrot.lane.b32.xlu1 %v3152_v49, %s2475_s23  ;;  %1676 = vrot.lane.b32.xlu0 %v1462_v41, %s2474_s22  ;;  %v708_v41 = vpop.f32.mrf.mxu0 }
 0x1fe   : > { %v3198_v40 = vadd.f32 %v708_v41, %v2918_v12 }
 0x1ff   : > { %v3165_v45 = vpop.permute.xlu1 %1185  ;;  %v959_v47 = vpop.permute.xlu0 %958 }
 0x200   : > { %v1071_v51 = vsel %vm1070_vm0, %v959_v47, %v1023_v37  ;;  %4139 = vst [vmem:[#allocation33_spill] sm:$0xff] %v3198_v40  ;;  %v3206_v47 = vadd.f32 %v704_v32, %v2953_v0 }
 0x201   : > { %v1103_v56 = vmul.f32 %v1071_v51, %v3160_v16  ;;  %1566 = vrot.lane.b32.xlu1 %v3152_v49, %s2474_s22  ;;  %1038 = vrot.lane.b32.xlu0 %v3163_v44, %s2474_s22 }
 0x202   : > { %4140 = vst [vmem:[#allocation34_spill] sm:$0xff] %v3206_v47 }
 0x203   : > { %v3178_v61 = vadd.f32 %v1103_v56, %v1087_v52  ;;  %v961_v2 = vpop.permute.xlu1 %960  ;;  %v3180_v6 = vpop.permute.xlu0 %1135 }
 0x204   : > { %v1072_v9 = vsel %vm1070_vm0, %v961_v2, %v1025_v42  ;;  %v1616_v2 = vmul.f32 %v2817_v23, %v2963_v5  ;;  %v1617_v23 = vmul.f32 %v2822_v24, %v2973_v10  ;;  %v3238_v24 = vld [vmem:[%s3149_s13 + $0x10] sm:$0xff] }
 0x205   : > { %v1104_v15 = vmul.f32 %v1072_v9, %v3176_v60  ;;  %1502 = vrot.lane.b32.xlu1 %v1463_v7, %s2475_s23  ;;  %1199 = vrot.lane.b32.xlu0 %v3163_v44, %s2475_s23 }
 0x207   : > { %v3191_v33 = vadd.f32 %v1104_v15, %v1088_v25  ;;  %v3193_v38 = vpop.permute.xlu1 %1137  ;;  %v1553_v37 = vpop.permute.xlu0 %1552 }
 0x209   : > { %1678 = vrot.lane.b32.xlu1 %v1463_v7, %s2474_s22  ;;  %974 = vrot.lane.b32.xlu0 %v934_v26, %s2475_s23 }
 0x20b   : > { %v1555_v42 = vpop.permute.xlu1 %1554  ;;  %v3200_v59 = vpop.permute.xlu0 %1712 }
 0x20d   : > { %1040 = vrot.lane.b32.xlu1 %v3198_v40, %s2474_s22  ;;  %1151 = vrot.lane.b32.xlu0 %v934_v26, %s2474_s22  ;;  %v935_v26 = vsub.f32 0.0, %v3198_v40 }
 0x20f   : > { %v3208_v51 = vpop.permute.xlu1 %1714  ;;  %v1489_v52 = vpop.permute.xlu0 %1488 }
 0x210   : > { %v1600_v56 = vsel %vm1070_vm0, %v1489_v52, %v1553_v37 }
 0x211   : > { %v1632_v7 = vmul.f32 %v1600_v56, %v3160_v16  ;;  %1201 = vrot.lane.b32.xlu1 %v3198_v40, %s2475_s23  ;;  %1728 = vrot.lane.b32.xlu0 %v3206_v47, %s2475_s23  ;;  %v1090_v40 = vmul.f32 %v2830_v28, %v2999_v30 }
 0x213   : > { %v3218_v9 = vadd.f32 %v1632_v7, %v1616_v2  ;;  %v1491_v25 = vpop.permute.xlu1 %1490  ;;  %v3220_v15 = vpop.permute.xlu0 %1664  ;;  %v1464_v2 = vsub.f32 0.0, %v3206_v47 }
 0x214   : > { %v1601_v32 = vsel %vm1070_vm0, %v1491_v25, %v1555_v42  ;;  %v710_v42 = vpop.f32.mrf.mxu0 }
 0x215   : > { %v1633_v37 = vmul.f32 %v1601_v32, %v3176_v60  ;;  %976 = vrot.lane.b32.xlu1 %v935_v26, %s2475_s23  ;;  %1568 = vrot.lane.b32.xlu0 %v3206_v47, %s2474_s22  ;;  %v3241_v7 = vadd.f32 %v710_v42, %v2953_v0 }
 0x217   : > { %v3230_v41 = vadd.f32 %v1633_v37, %v1617_v23  ;;  %v3232_v52 = vpop.permute.xlu1 %1666  ;;  %v1027_v56 = vpop.permute.xlu0 %1026  ;;  %4142 = vst [vmem:[#allocation36_spill] sm:$0xff] %v3241_v7  ;;  %v1089_v37 = vmul.f32 %v2827_v27, %v2992_v29 }
 0x219   : > { %4141 = vst [vmem:[#allocation35_spill] sm:$0xff] %v3230_v41  ;;  %1153 = vrot.lane.b32.xlu1 %v935_v26, %s2474_s22  ;;  %1504 = vrot.lane.b32.xlu0 %v1464_v2, %s2475_s23  ;;  %v714_v26 = vpop.f32.mrf.mxu0 }
 0x21a   : > { %v3253_v42 = vadd.f32 %v714_v26, %v2918_v12 }
 0x21b   : > { %v963_v25 = vpop.permute.xlu1 %962  ;;  %v3243_v32 = vpop.permute.xlu0 %1187 }
 0x21c   : > { %v1073_v23 = vsel %vm1070_vm0, %v963_v25, %v1027_v56  ;;  %4143 = vst [vmem:[#allocation37_spill] sm:$0xff] %v3253_v42 }
 0x21d   : > { %v1105_v36 = vmul.f32 %v1073_v23, %v3238_v24  ;;  %1730 = vrot.lane.b32.xlu1 %v3241_v7, %s2475_s23  ;;  %1680 = vrot.lane.b32.xlu0 %v1464_v2, %s2474_s22  ;;  %v1465_v2 = vsub.f32 0.0, %v3241_v7  ;;  %v716_v23 = vpop.f32.mrf.mxu0 }
 0x21f   : > { %v3255_v19 = vadd.f32 %v1105_v36, %v1089_v37  ;;  %v1029_v35 = vpop.permute.xlu1 %1028  ;;  %v3257_v20 = vpop.permute.xlu0 %1139  ;;  %v936_v36 = vsub.f32 0.0, %v3253_v42  ;;  %v3273_v37 = vld [vmem:[%s3149_s13 + $0x18] sm:$0xff] }
 0x221   : > { %1570 = vrot.lane.b32.xlu1 %v3241_v7, %s2474_s22  ;;  %1042 = vrot.lane.b32.xlu0 %v3253_v42, %s2474_s22  ;;  %v720_v7 = vpop.f32.mrf.mxu0 }
 0x222   : > { %v3282_v49 = vadd.f32 %v720_v7, %v2918_v12  ;;  %v3296_v7 = vadd.f32 %v716_v23, %v2953_v0 }
 0x223   : > { %v3263_v56 = vpop.permute.xlu1 %1189  ;;  %v3265_v25 = vpop.permute.xlu0 %1716 }
 0x224   : > { %4144 = vst [vmem:[#allocation38_spill] sm:$0xff] %v3282_v49  ;;  %4146 = vst [vmem:[#allocation40_spill] sm:$0xff] %v3296_v7 }
 0x225   : > { %1506 = vrot.lane.b32.xlu1 %v1465_v2, %s2475_s23  ;;  %1203 = vrot.lane.b32.xlu0 %v3253_v42, %s2475_s23 }
 0x227   : > { %v965_v26 = vpop.permute.xlu1 %964  ;;  %v1557_v11 = vpop.permute.xlu0 %1556 }
 0x228   : > { %v1074_v22 = vsel %vm1070_vm0, %v965_v26, %v1029_v35  ;;  %v1618_v26 = vmul.f32 %v2827_v27, %v3012_v39 }
 0x229   : > { %v1106_v8 = vmul.f32 %v1074_v22, %v3273_v37  ;;  %1682 = vrot.lane.b32.xlu1 %v1465_v2, %s2474_s22  ;;  %978 = vrot.lane.b32.xlu0 %v936_v36, %s2475_s23 }
 0x22b   : > { %v3284_v42 = vadd.f32 %v1106_v8, %v1090_v40  ;;  %v3286_v47 = vpop.permute.xlu1 %1141  ;;  %v1493_v21 = vpop.permute.xlu0 %1492 }
 0x22c   : > { %v1602_v35 = vsel %vm1070_vm0, %v1493_v21, %v1557_v11  ;;  %v937_v11 = vsub.f32 0.0, %v3282_v49 }
 0x22d   : > { %4145 = vst [vmem:[#allocation39_spill] sm:$0xff] %v3284_v42  ;;  %v1634_v22 = vmul.f32 %v1602_v35, %v3238_v24  ;;  %1044 = vrot.lane.b32.xlu1 %v3282_v49, %s2474_s22  ;;  %1155 = vrot.lane.b32.xlu0 %v936_v36, %s2474_s22  ;;  %v1466_v35 = vsub.f32 0.0, %v3296_v7 }
 0x22f   : > { %v3298_v8 = vadd.f32 %v1634_v22, %v1618_v26  ;;  %v3300_v40 = vpop.permute.xlu1 %1718  ;;  %v3302_v2 = vpop.permute.xlu0 %1668  ;;  %v1619_v22 = vmul.f32 %v2830_v28, %v3026_v43  ;;  %v1091_v28 = vmul.f32 %v2837_v31, %v3032_v50 }
 0x231   : > { %1205 = vrot.lane.b32.xlu1 %v3282_v49, %s2475_s23  ;;  %1732 = vrot.lane.b32.xlu0 %v3296_v7, %s2475_s23  ;;  %v722_v49 = vpop.f32.mrf.mxu0 }
 0x232   : > { %v3325_v44 = vadd.f32 %v722_v49, %v2953_v0 }
 0x233   : > { %v1559_v27 = vpop.permute.xlu1 %1558  ;;  %v1031_v21 = vpop.permute.xlu0 %1030 }
 0x234   : > { %4147 = vst [vmem:[#allocation41_spill] sm:$0xff] %v3325_v44  ;;  %v726_v49 = vpop.f32.mrf.mxu0 }
 0x235   : > { %980 = vrot.lane.b32.xlu1 %v937_v11, %s2475_s23  ;;  %1572 = vrot.lane.b32.xlu0 %v3296_v7, %s2474_s22 }
 0x237   : > { %v1495_v36 = vpop.permute.xlu1 %1494  ;;  %v3312_v23 = vpop.permute.xlu0 %1191 }
 0x238   : > { %v1603_v26 = vsel %vm1070_vm0, %v1495_v36, %v1559_v27 }
 0x239   : > { %v1635_v18 = vmul.f32 %v1603_v26, %v3273_v37  ;;  %1157 = vrot.lane.b32.xlu1 %v937_v11, %s2474_s22  ;;  %1508 = vrot.lane.b32.xlu0 %v1466_v35, %s2475_s23 }
 0x23b   : > { %v3327_v1 = vadd.f32 %v1635_v18, %v1619_v22  ;;  %v3329_v7 = vpop.permute.xlu1 %1670  ;;  %v967_v27 = vpop.permute.xlu0 %966  ;;  %v3339_v18 = vadd.f32 %v726_v49, %v2918_v12 }
 0x23c   : > { %v1075_v36 = vsel %vm1070_vm0, %v967_v27, %v1031_v21 }
 0x23d   : > { %4148 = vst [vmem:[#allocation42_spill] sm:$0xff] %v3327_v1  ;;  %v1107_v11 = vmul.f32 %v1075_v36, %v3322_v4  ;;  %1734 = vrot.lane.b32.xlu1 %v3325_v44, %s2475_s23  ;;  %1684 = vrot.lane.b32.xlu0 %v1466_v35, %s2474_s22  ;;  %4149 = vst [vmem:[#allocation43_spill] sm:$0xff] %v3339_v18  ;;  %v1467_v35 = vsub.f32 0.0, %v3325_v44  ;;  %v938_v36 = vsub.f32 0.0, %v3339_v18 }
 0x23f   : > { %v3341_v26 = vadd.f32 %v1107_v11, %v1091_v28  ;;  %v1033_v22 = vpop.permute.xlu1 %1032  ;;  %v3343_v21 = vpop.permute.xlu0 %1143  ;;  %v3359_v11 = vld [vmem:[%s3149_s13 + $0x28] sm:$0xff] }
 0x240   : > { %v728_v28 = vpop.f32.mrf.mxu0 }
 0x241   : > { %4150 = vst [vmem:[#allocation44_spill] sm:$0xff] %v3341_v26  ;;  %1574 = vrot.lane.b32.xlu1 %v3325_v44, %s2474_s22  ;;  %1046 = vrot.lane.b32.xlu0 %v3339_v18, %s2474_s22  ;;  %v1092_v44 = vmul.f32 %v3363_v62, %v3044_v46  ;;  %v1620_v62 = vmul.f32 %v2343_v57, %v3058_v54 }
 0x243   : > { %v3349_v31 = vpop.permute.xlu1 %1193  ;;  %v3351_v27 = vpop.permute.xlu0 %1720 }
 0x245   : > { %1510 = vrot.lane.b32.xlu1 %v1467_v35, %s2475_s23  ;;  %1207 = vrot.lane.b32.xlu0 %v3339_v18, %s2475_s23  ;;  %v732_v18 = vpop.f32.mrf.mxu0 }
 0x246   : > { %v3371_v42 = vadd.f32 %v732_v18, %v2918_v12  ;;  %v3385_v18 = vadd.f32 %v728_v28, %v2953_v0 }
 0x247   : > { %v969_v49 = vpop.permute.xlu1 %968  ;;  %v1561_v1 = vpop.permute.xlu0 %1560 }
 0x248   : > { %v1076_v34 = vsel %vm1070_vm0, %v969_v49, %v1033_v22  ;;  %4152 = vst [vmem:[#allocation46_spill] sm:$0xff] %v3371_v42  ;;  %4154 = vst [vmem:[#allocation48_spill] sm:$0xff] %v3385_v18 }
 0x249   : > { %v1108_v63 = vmul.f32 %v1076_v34, %v3359_v11  ;;  %1686 = vrot.lane.b32.xlu1 %v1467_v35, %s2474_s22  ;;  %982 = vrot.lane.b32.xlu0 %v938_v36, %s2475_s23 }
 0x24b   : > { %v3373_v3 = vadd.f32 %v1108_v63, %v1092_v44  ;;  %v3375_v43 = vpop.permute.xlu1 %1145  ;;  %v1497_v22 = vpop.permute.xlu0 %1496 }
 0x24c   : > { %v1604_v49 = vsel %vm1070_vm0, %v1497_v22, %v1561_v1  ;;  %v1468_v22 = vsub.f32 0.0, %v3385_v18 }
 0x24d   : > { %4153 = vst [vmem:[#allocation47_spill] sm:$0xff] %v3373_v3  ;;  %v1636_v34 = vmul.f32 %v1604_v49, %v3322_v4  ;;  %1048 = vrot.lane.b32.xlu1 %v3371_v42, %s2474_s22  ;;  %1159 = vrot.lane.b32.xlu0 %v938_v36, %s2474_s22  ;;  %v939_v36 = vsub.f32 0.0, %v3371_v42  ;;  %v734_v49 = vpop.f32.mrf.mxu0 }
 0x24f   : > { %v3387_v63 = vadd.f32 %v1636_v34, %v1620_v62  ;;  %v3389_v44 = vpop.permute.xlu1 %1722  ;;  %v3391_v35 = vpop.permute.xlu0 %1672  ;;  %v3413_v34 = vadd.f32 %v734_v49, %v2953_v0 }
 0x250   : > { %v738_v46 = vpop.f32.mrf.mxu0 }
 0x251   : > { %4155 = vst [vmem:[#allocation49_spill] sm:$0xff] %v3387_v63  ;;  %1209 = vrot.lane.b32.xlu1 %v3371_v42, %s2475_s23  ;;  %1736 = vrot.lane.b32.xlu0 %v3385_v18, %s2475_s23  ;;  %4159 = vst [vmem:[#allocation53_spill] sm:$0xff] %v3413_v34 }
 0x253   : > { %v3397_v57 = vpop.permute.xlu1 %1562  ;;  %v3399_v1 = vpop.permute.xlu0 %1034 }
 0x254   : > { %4156 = vst [vmem:[#allocation50_spill] sm:$0xff] %v3397_v57  ;;  %4157 = vst [vmem:[#allocation51_spill] sm:$0xff] %v3399_v1 }
 0x255   : > { %984 = vrot.lane.b32.xlu1 %v939_v36, %s2475_s23  ;;  %1576 = vrot.lane.b32.xlu0 %v3385_v18, %s2474_s22  ;;  %v3423_v18 = vadd.f32 %v738_v46, %v2918_v12 }
 0x257   : > { %v3405_v62 = vpop.permute.xlu1 %1498  ;;  %v3407_v28 = vpop.permute.xlu0 %1195  ;;  %4161 = vst [vmem:[#allocation55_spill] sm:$0xff] %v3423_v18  ;;  %v940_v46 = vsub.f32 0.0, %v3423_v18 }
 0x258   : > { %4158 = vst [vmem:[#allocation52_spill] sm:$0xff] %v3405_v62 }
 0x259   : > { %1161 = vrot.lane.b32.xlu1 %v939_v36, %s2474_s22  ;;  %1512 = vrot.lane.b32.xlu0 %v1468_v22, %s2475_s23 }
 0x25b   : > { %v3415_v42 = vpop.permute.xlu1 %1674  ;;  %v3417_v3 = vpop.permute.xlu0 %970 }
 0x25c   : > { %4160 = vst [vmem:[#allocation54_spill] sm:$0xff] %v3417_v3 }
 0x25d   : > { %1738 = vrot.lane.b32.xlu1 %v3413_v34, %s2475_s23  ;;  %1688 = vrot.lane.b32.xlu0 %v1468_v22, %s2474_s22  ;;  %v1469_v22 = vsub.f32 0.0, %v3413_v34 }
 0x25f   : > { %v3425_v36 = vpop.permute.xlu1 %1036  ;;  %v3427_v62 = vpop.permute.xlu0 %1147 }
 0x260   : > { %4162 = vst [vmem:[#allocation56_spill] sm:$0xff] %v3425_v36  ;;  %v740_v36 = vpop.f32.mrf.mxu0 }
 0x261   : > { %1578 = vrot.lane.b32.xlu1 %v3413_v34, %s2474_s22  ;;  %1050 = vrot.lane.b32.xlu0 %v3423_v18, %s2474_s22 }
 0x262   : > { %v744_v30 = vpop.f32.mrf.mxu0 }
 0x263   : > { %v3433_v49 = vpop.permute.xlu1 %1197  ;;  %v3435_v57 = vpop.permute.xlu0 %1724  ;;  %v3449_v26 = vadd.f32 %v744_v30, %v2918_v12 }
 0x264   : > { %v746_v3 = vpop.f32.mrf.mxu0 }
 0x265   : > { %1514 = vrot.lane.b32.xlu1 %v1469_v22, %s2475_s23  ;;  %1211 = vrot.lane.b32.xlu0 %v3423_v18, %s2475_s23  ;;  %4165 = vst [vmem:[#allocation59_spill] sm:$0xff] %v3449_v26  ;;  %v3459_v18 = vadd.f32 %v740_v36, %v2953_v0 }
 0x267   : > { %v3442_v63 = vpop.permute.xlu1 %972  ;;  %v3444_v54 = vpop.permute.xlu0 %1564  ;;  %4167 = vst [vmem:[#allocation61_spill] sm:$0xff] %v3459_v18 }
 0x268   : > { %4163 = vst [vmem:[#allocation57_spill] sm:$0xff] %v3442_v63  ;;  %4164 = vst [vmem:[#allocation58_spill] sm:$0xff] %v3444_v54  ;;  %v1470_v54 = vsub.f32 0.0, %v3459_v18 }
 0x269   : > { %1690 = vrot.lane.b32.xlu1 %v1469_v22, %s2474_s22  ;;  %986 = vrot.lane.b32.xlu0 %v940_v46, %s2475_s23 }
 0x26b   : > { %v3451_v34 = vpop.permute.xlu1 %1149  ;;  %v3453_v41 = vpop.permute.xlu0 %1500 }
 0x26c   : > { %4166 = vst [vmem:[#allocation60_spill] sm:$0xff] %v3453_v41  ;;  %v941_v41 = vsub.f32 0.0, %v3449_v26 }
 0x26d   : > { %1052 = vrot.lane.b32.xlu1 %v3449_v26, %s2474_s22  ;;  %1163 = vrot.lane.b32.xlu0 %v940_v46, %s2474_s22 }
 0x26f   : > { %v3461_v22 = vpop.permute.xlu1 %1726  ;;  %v3463_v63 = vpop.permute.xlu0 %1676 }
 0x271   : > { %1213 = vrot.lane.b32.xlu1 %v3449_v26, %s2475_s23  ;;  %1740 = vrot.lane.b32.xlu0 %v3459_v18, %s2475_s23  ;;  %v3486_v26 = vadd.f32 %v746_v3, %v2953_v0 }
 0x273   : > { %v3469_v12 = vpop.permute.xlu1 %1566  ;;  %v1039_v30 = vpop.permute.xlu0 %1038  ;;  %4170 = vst [vmem:[#allocation64_spill] sm:$0xff] %v3486_v26 }
 0x274   : > { %4168 = vst [vmem:[#allocation62_spill] sm:$0xff] %v3469_v12  ;;  %v3483_v12 = vld [vmem:[%s3149_s13 + $0x40] sm:$0xff] }
 0x275   : > { %988 = vrot.lane.b32.xlu1 %v941_v41, %s2475_s23  ;;  %1580 = vrot.lane.b32.xlu0 %v3459_v18, %s2474_s22 }
 0x277   : > { %v3475_v36 = vpop.permute.xlu1 %1502  ;;  %v3477_v46 = vpop.permute.xlu0 %1199 }
 0x278   : > { %4169 = vst [vmem:[#allocation63_spill] sm:$0xff] %v3475_v36  ;;  %v1231_v36 = vsel %vm1070_vm0, %v3180_v6, %v3154_v58  ;;  %v1760_v58 = vsel %vm1070_vm0, %v3220_v15, %v3200_v59  ;;  %v3521_v59 = vld [vmem:[%s3149_s13 + $0x48] sm:$0xff] }
 0x279   : > { %1165 = vrot.lane.b32.xlu1 %v941_v41, %s2474_s22  ;;  %1516 = vrot.lane.b32.xlu0 %v1470_v54, %s2475_s23  ;;  %v1327_v0 = vmul.f32 %v1231_v36, %v3160_v16 }
 0x27b   : > { %v3488_v1 = vpop.permute.xlu1 %1678  ;;  %v975_v17 = vpop.permute.xlu0 %974 }
 0x27c   : > { %v1079_v50 = vsel %vm1070_vm0, %v975_v17, %v1039_v30  ;;  %v1233_v30 = vsel %vm1070_vm0, %v3257_v20, %v3243_v32 }
 0x27d   : > { %v3495_v18 = vmul.f32 %v1079_v50, %v3483_v12  ;;  %1742 = vrot.lane.b32.xlu1 %v3486_v26, %s2475_s23  ;;  %1692 = vrot.lane.b32.xlu0 %v1470_v54, %s2474_s22  ;;  %v1792_v50 = vmul.f32 %v1760_v58, %v3160_v16  ;;  %v1471_v54 = vsub.f32 0.0, %v3486_v26  ;;  %v1329_v15 = vmul.f32 %v1233_v30, %v3238_v24 }
 0x27e   : > { %v1762_v58 = vsel %vm1070_vm0, %v3302_v2, %v3265_v25  ;;  %v1235_v25 = vsel %vm1070_vm0, %v3343_v21, %v3312_v23  ;;  %v1764_v23 = vsel %vm1070_vm0, %v3391_v35, %v3351_v27 }
 0x27f   : > { %v1041_v3 = vpop.permute.xlu1 %1040  ;;  %v3501_v41 = vpop.permute.xlu0 %1151  ;;  %v1794_v30 = vmul.f32 %v1762_v58, %v3238_v24  ;;  %v1796_v21 = vmul.f32 %v1764_v23, %v3322_v4 }
 0x281   : > { %1582 = vrot.lane.b32.xlu1 %v3486_v26, %s2474_s22  ;;  %1359 = vrot.lane.b32.xlu0 %v1327_v0, %s2473_s21  ;;  %v1232_v0 = vsel %vm1070_vm0, %v3193_v38, %v3165_v45  ;;  %v1761_v38 = vsel %vm1070_vm0, %v3232_v52, %v3208_v51  ;;  %v1234_v52 = vsel %vm1070_vm0, %v3286_v47, %v3263_v56  ;;  %v3575_v56 = vld [vmem:[%s3149_s13 + $0x30] sm:$0xff] }
 0x282   : > { %v1793_v24 = vmul.f32 %v1761_v38, %v3176_v60  ;;  %v1237_v47 = vsel %vm1070_vm0, %v3427_v62, %v3407_v28 }
 0x283   : > { %v3510_v17 = vpop.permute.xlu1 %1201  ;;  %v3512_v6 = vpop.permute.xlu0 %1728 }
 0x285   : > { %1518 = vrot.lane.b32.xlu1 %v1471_v54, %s2475_s23  ;;  %1824 = vrot.lane.b32.xlu0 %v1792_v50, %s2473_s21  ;;  %v1328_v50 = vmul.f32 %v1232_v0, %v3176_v60  ;;  %v1330_v60 = vmul.f32 %v1234_v52, %v3273_v37  ;;  %v1763_v0 = vsel %vm1070_vm0, %v3329_v7, %v3300_v40 }
 0x286   : > { %v1795_v27 = vmul.f32 %v1763_v0, %v3273_v37  ;;  %v1236_v7 = vsel %vm1070_vm0, %v3375_v43, %v3349_v31  ;;  %v1766_v40 = vsel %vm1070_vm0, %v3463_v63, %v3435_v57  ;;  %v920_v37 = vld [vmem:[%s3149_s13 + $0x50] sm:$0xff]  ;;  %v1765_v31 = vsel %vm1070_vm0, %v3415_v42, %v3389_v44 }
 0x287   : > { %v977_v36 = vpop.permute.xlu1 %976  ;;  %v1569_v16 = vpop.permute.xlu0 %1568  ;;  %v1239_v63 = vsel %vm1070_vm0, %v3501_v41, %v3477_v46  ;;  %v1797_v38 = vmul.f32 %v1765_v31, %v3359_v11  ;;  %v1238_v42 = vsel %vm1070_vm0, %v3451_v34, %v3433_v49  ;;  %v3615_v46 = vld [vmem:[%s3149_s13 + $0x38] sm:$0xff] }
 0x288   : > { %v1080_v20 = vsel %vm1070_vm0, %v977_v36, %v1041_v3  ;;  %v1334_v41 = vmul.f32 %v1238_v42, %v3615_v46  ;;  %v921_v49 = vld [vmem:[%s3149_s13 + $0x58] sm:$0xff] }
 0x289   : > { %v3532_v32 = vmul.f32 %v1080_v20, %v3521_v59  ;;  %1694 = vrot.lane.b32.xlu1 %v1471_v54, %s2474_s22  ;;  %1363 = vrot.lane.b32.xlu0 %v1329_v15, %s2473_s21  ;;  %v1331_v54 = vmul.f32 %v1235_v25, %v3322_v4  ;;  %v1333_v4 = vmul.f32 %v1237_v47, %v3575_v56 }
 0x28a   : > { %v1332_v20 = vmul.f32 %v1236_v7, %v3359_v11  ;;  %v1335_v25 = vmul.f32 %v1239_v63, %v3483_v12  ;;  %v922_v63 = vld [vmem:[%s3149_s13 + $0x60] sm:$0xff] }
 0x28b   : > { %v3538_v26 = vpop.permute.xlu1 %1153  ;;  %v1505_v45 = vpop.permute.xlu0 %1504 }
 0x28c   : > { %v1608_v2 = vsel %vm1070_vm0, %v1505_v45, %v1569_v16 }
 0x28d   : > { %v3548_v3 = vmul.f32 %v1608_v2, %v3483_v12  ;;  %1361 = vrot.lane.b32.xlu1 %v1328_v50, %s2473_s21  ;;  %1828 = vrot.lane.b32.xlu0 %v1794_v30, %s2473_s21  ;;  %v1798_v50 = vmul.f32 %v1766_v40, %v3575_v56 }
 0x28f   : > { %v3554_v15 = vpop.permute.xlu1 %1730  ;;  %v1681_v51 = vpop.permute.xlu0 %1680 }
 0x290   : > { %v1768_v44 = vsel %vm1070_vm0, %v1681_v51, %v3512_v6 }
 0x291   : > { %1826 = vrot.lane.b32.xlu1 %v1793_v24, %s2473_s21  ;;  %1367 = vrot.lane.b32.xlu0 %v1331_v54, %s2473_s21  ;;  %v1800_v54 = vmul.f32 %v1768_v44, %v3483_v12  ;;  %v1240_v12 = vsel %vm1070_vm0, %v3538_v26, %v3510_v17 }
 0x293   : > { %v1571_v36 = vpop.permute.xlu1 %1570  ;;  %v1043_v16 = vpop.permute.xlu0 %1042 }
 0x295   : > { %1365 = vrot.lane.b32.xlu1 %v1330_v60, %s2473_s21  ;;  %1832 = vrot.lane.b32.xlu0 %v1796_v21, %s2473_s21  ;;  %v1767_v60 = vsel %vm1070_vm0, %v3488_v1, %v3461_v22  ;;  %v1336_v1 = vmul.f32 %v1240_v12, %v3521_v59 }
 0x296   : > { %v1799_v6 = vmul.f32 %v1767_v60, %v3615_v46  ;;  %v923_v60 = vld [vmem:[%s3149_s13 + $0x68] sm:$0xff] }
 0x297   : > { %v1507_v35 = vpop.permute.xlu1 %1506  ;;  %v1204_v58 = vpop.permute.xlu0 %1203 }
 0x298   : > { %v1609_v62 = vsel %vm1070_vm0, %v1507_v35, %v1571_v36 }
 0x299   : > { %v3587_v28 = vmul.f32 %v1609_v62, %v3521_v59  ;;  %1830 = vrot.lane.b32.xlu1 %v1795_v27, %s2473_s21  ;;  %1371 = vrot.lane.b32.xlu0 %v1333_v4, %s2473_s21 }
 0x29b   : > { %v1683_v30 = vpop.permute.xlu1 %1682  ;;  %v979_v43 = vpop.permute.xlu0 %978 }
 0x29c   : > { %v1081_v57 = vsel %vm1070_vm0, %v979_v43, %v1043_v16  ;;  %v1769_v27 = vsel %vm1070_vm0, %v1683_v30, %v3554_v15 }
 0x29d   : > { %v3601_v45 = vmul.f32 %v1081_v57, %v920_v37  ;;  %1369 = vrot.lane.b32.xlu1 %v1332_v20, %s2473_s21  ;;  %1836 = vrot.lane.b32.xlu0 %v1798_v50, %s2473_s21  ;;  %v1801_v26 = vmul.f32 %v1769_v27, %v3521_v59 }
 0x29f   : > { %v1045_v2 = vpop.permute.xlu1 %1044  ;;  %v1156_v24 = vpop.permute.xlu0 %1155 }
 0x2a0   : > { %v1241_v34 = vsel %vm1070_vm0, %v1156_v24, %v1204_v58 }
 0x2a1   : > { %1834 = vrot.lane.b32.xlu1 %v1797_v38, %s2473_s21  ;;  %1375 = vrot.lane.b32.xlu0 %v1335_v25, %s2473_s21  ;;  %v1337_v51 = vmul.f32 %v1241_v34, %v920_v37 }
 0x2a3   : > { %v1206_v52 = vpop.permute.xlu1 %1205  ;;  %v1733_v23 = vpop.permute.xlu0 %1732 }
 0x2a5   : > { %1373 = vrot.lane.b32.xlu1 %v1334_v41, %s2473_s21  ;;  %1840 = vrot.lane.b32.xlu0 %v1800_v54, %s2473_s21 }
 0x2a7   : > { %v981_v21 = vpop.permute.xlu1 %980  ;;  %v1573_v36 = vpop.permute.xlu0 %1572 }
 0x2a8   : > { %v1082_v16 = vsel %vm1070_vm0, %v981_v21, %v1045_v2 }
 0x2a9   : > { %v3631_v0 = vmul.f32 %v1082_v16, %v921_v49  ;;  %1838 = vrot.lane.b32.xlu1 %v1799_v6, %s2473_s21  ;;  %1379 = vrot.lane.b32.xlu0 %v1337_v51, %s2473_s21 }
 0x2ab   : > { %v1158_v22 = vpop.permute.xlu1 %1157  ;;  %v1509_v47 = vpop.permute.xlu0 %1508 }
 0x2ac   : > { %v1610_v4 = vsel %vm1070_vm0, %v1509_v47, %v1573_v36  ;;  %v1242_v7 = vsel %vm1070_vm0, %v1158_v22, %v1206_v52 }
 0x2ad   : > { %v3639_v35 = vmul.f32 %v1610_v4, %v920_v37  ;;  %1377 = vrot.lane.b32.xlu1 %v1336_v1, %s2473_s21  ;;  %v1338_v20 = vmul.f32 %v1242_v7, %v921_v49 }
 0x2af   : > { %v1735_v17 = vpop.permute.xlu1 %1734  ;;  %v1685_v58 = vpop.permute.xlu0 %1684 }
 0x2b0   : > { %v1770_v40 = vsel %vm1070_vm0, %v1685_v58, %v1733_v23 }
 0x2b1   : > { %v1802_v62 = vmul.f32 %v1770_v40, %v920_v37  ;;  %1842 = vrot.lane.b32.xlu1 %v1801_v26, %s2473_s21 }
 0x2b3   : > { %v1575_v15 = vpop.permute.xlu1 %1574  ;;  %1844 = vrot.lane.b32.xlu0 %v1802_v62, %s2473_s21  ;;  %v1047_v50 = vpop.permute.xlu0 %1046 }
 0x2b5   : > { %1381 = vrot.lane.b32.xlu1 %v1338_v20, %s2473_s21 }
 0x2b7   : > { %v1511_v30 = vpop.permute.xlu1 %1510  ;;  %v1208_v43 = vpop.permute.xlu0 %1207 }
 0x2b8   : > { %v1611_v59 = vsel %vm1070_vm0, %v1511_v30, %v1575_v15  ;;  %v924_v15 = vld [vmem:[%s3149_s13 + $0x70] sm:$0xff] }
 0x2b9   : > { %v3649_v31 = vmul.f32 %v1611_v59, %v921_v49 }
 0x2bb   : > { %v1687_v57 = vpop.permute.xlu1 %1686  ;;  %v983_v38 = vpop.permute.xlu0 %982 }
 0x2bc   : > { %v1771_v37 = vsel %vm1070_vm0, %v1687_v57, %v1735_v17  ;;  %v1083_v25 = vsel %vm1070_vm0, %v983_v38, %v1047_v50 }
 0x2bd   : > { %v1803_v2 = vmul.f32 %v1771_v37, %v921_v49  ;;  %v3654_v24 = vmul.f32 %v1083_v25, %v922_v63 }
 0x2bf   : > { %v1049_v42 = vpop.permute.xlu1 %1048  ;;  %1846 = vrot.lane.b32.xlu1 %v1803_v2, %s2473_s21  ;;  %v1160_v44 = vpop.permute.xlu0 %1159 }
 0x2c0   : > { %v1243_v41 = vsel %vm1070_vm0, %v1160_v44, %v1208_v43 }
 0x2c1   : > { %v1339_v54 = vmul.f32 %v1243_v41, %v922_v63  ;;  %v925_v41 = vld [vmem:[%s3149_s13 + $0x78] sm:$0xff]  ;;  %s2476_s13 = smov [#allocation2]  }
 0x2c2   : > { %s2358_s22 = sshll.u32 %s2476_s13, 4  ;;  %s2359_s22 = int_to_ptr.vmem [resolvable:$false] %s2358_s22 }
 0x2c3   : > { %v1210_v52 = vpop.permute.xlu1 %1209  ;;  %1383 = vrot.lane.b32.xlu0 %v1339_v54, %s2473_s21  ;;  %v1737_v23 = vpop.permute.xlu0 %1736  ;;  %s2360_s23 = scalar_lea.vmem %s2359_s22, 4096  ;;  %p2361_p0 = scmp.lt.s32.totalorder %s3906_s20, %s2359_s22 }
 0x2c4   : > { %p2362_p1 = scmp.lt.s32.totalorder %s2360_s23, %s2354_s26 }
 0x2c6   : > { %p2363_p2 = por %p2362_p1, %p2361_p0 }
 0x2c7   : > { %v985_v34 = vpop.permute.xlu1 %984  ;;  %v1577_v6 = vpop.permute.xlu0 %1576 }
 0x2c8   : > { %v1084_v51 = vsel %vm1070_vm0, %v985_v34, %v1049_v42  ;;  %p2364_p3 = pnand %p2363_p2, %p2357_p13 }
 0x2c9   : > { %v3661_v21 = vmul.f32 %v1084_v51, %v923_v60 }
 0x2cb   : > { %v1162_v49 = vpop.permute.xlu1 %1161  ;;  %v1513_v36 = vpop.permute.xlu0 %1512 }
 0x2cc   : > { %v1244_v12 = vsel %vm1070_vm0, %v1162_v49, %v1210_v52  ;;  %v1612_v16 = vsel %vm1070_vm0, %v1513_v36, %v1577_v6 }
 0x2cd   : > { %v1340_v1 = vmul.f32 %v1244_v12, %v923_v60  ;;  %v3665_v22 = vmul.f32 %v1612_v16, %v922_v63 }
 0x2cf   : > { %v1739_v47 = vpop.permute.xlu1 %1738  ;;  %1385 = vrot.lane.b32.xlu1 %v1340_v1, %s2473_s21  ;;  %v1689_v27 = vpop.permute.xlu0 %1688 }
 0x2d0   : > { %v1772_v4 = vsel %vm1070_vm0, %v1689_v27, %v1737_v23 }
 0x2d1   : > { %v1804_v26 = vmul.f32 %v1772_v4, %v922_v63  ;;  %v1311_v4 = vmul.f32 %v3050_v53, %v2922_v48 }
 0x2d3   : > { %v1579_v17 = vpop.permute.xlu1 %1578  ;;  %1848 = vrot.lane.b32.xlu0 %v1804_v26, %s2473_s21  ;;  %v1051_v58 = vpop.permute.xlu0 %1050 }
 0x2d7   : > { %v1515_v7 = vpop.permute.xlu1 %1514  ;;  %v1212_v40 = vpop.permute.xlu0 %1211 }
 0x2d8   : > { %v1613_v62 = vsel %vm1070_vm0, %v1515_v7, %v1579_v17 }
 0x2d9   : > { %v3671_v20 = vmul.f32 %v1613_v62, %v923_v60 }
 0x2db   : > { %v1691_v50 = vpop.permute.xlu1 %1690  ;;  %v987_v30 = vpop.permute.xlu0 %986 }
 0x2dc   : > { %v1773_v43 = vsel %vm1070_vm0, %v1691_v50, %v1739_v47  ;;  %v1085_v59 = vsel %vm1070_vm0, %v987_v30, %v1051_v58 }
 0x2dd   : > { %v1805_v57 = vmul.f32 %v1773_v43, %v923_v60  ;;  %v3676_v63 = vmul.f32 %v1085_v59, %v924_v15 }
 0x2df   : > { %v1053_v38 = vpop.permute.xlu1 %1052  ;;  %1850 = vrot.lane.b32.xlu1 %v1805_v57, %s2473_s21  ;;  %v1164_v37 = vpop.permute.xlu0 %1163 }
 0x2e0   : > { %v1245_v25 = vsel %vm1070_vm0, %v1164_v37, %v1212_v40  ;;  %v1776_v40 = vmul.f32 %v3050_v53, %v2963_v5 }
 0x2e1   : > { %v1341_v2 = vmul.f32 %v1245_v25, %v924_v15 }
 0x2e3   : > { %v1214_v42 = vpop.permute.xlu1 %1213  ;;  %1387 = vrot.lane.b32.xlu0 %v1341_v2, %s2473_s21  ;;  %v1741_v44 = vpop.permute.xlu0 %1740 }
 0x2e7   : > { %v989_v54 = vpop.permute.xlu1 %988  ;;  %v1581_v52 = vpop.permute.xlu0 %1580 }
 0x2e8   : > { %v1086_v23 = vsel %vm1070_vm0, %v989_v54, %v1053_v38  ;;  %v4171_v54 = vld [vmem:[#allocation11_spill] sm:$0xff] }
 0x2e9   : > { %v3683_v34 = vmul.f32 %v1086_v23, %v925_v41 }
 0x2eb   : > { %v1166_v60 = vpop.permute.xlu1 %1165  ;;  %v1517_v6 = vpop.permute.xlu0 %1516 }
 0x2ec   : > { %v1246_v51 = vsel %vm1070_vm0, %v1166_v60, %v1214_v42  ;;  %v1614_v49 = vsel %vm1070_vm0, %v1517_v6, %v1581_v52 }
 0x2ed   : > { %v1342_v36 = vmul.f32 %v1246_v51, %v925_v41  ;;  %v3687_v12 = vmul.f32 %v1614_v49, %v924_v15  ;;  %v4173_v51 = vld [vmem:[#allocation51_spill] sm:$0xff]  ;;  %v4174_v49 = vld [vmem:[#allocation54_spill] sm:$0xff] }
 0x2ef   : > { %1389 = vrot.lane.b32.xlu1 %v1342_v36, %s2473_s21  ;;  %v1743_v16 = vpop.permute.xlu1 %1742  ;;  %v1693_v1 = vpop.permute.xlu0 %1692  ;;  %v4175_v36 = vld [vmem:[#allocation35_spill] sm:$0xff] }
 0x2f0   : > { %v1774_v47 = vsel %vm1070_vm0, %v1693_v1, %v1741_v44  ;;  %v4178_v1 = vld [vmem:[#allocation14_spill] sm:$0xff] }
 0x2f1   : > { %v1806_v27 = vmul.f32 %v1774_v47, %v924_v15 }
 0x2f3   : > { %v1583_v26 = vpop.permute.xlu1 %1582  ;;  %1852 = vrot.lane.b32.xlu0 %v1806_v27, %s2473_s21  ;;  %v1360_v17 = vpop.permute.xlu0 %1359  ;;  %v4179_v27 = vld [vmem:[#allocation13_spill] sm:$0xff] }
 0x2f4   : > { %v1407_v58 = vadd.f32 %v1360_v17, %v1311_v4 }
 0x2f6   : > { %v1424_v7 = vsel %vm1423_vm1, %v3178_v61, %v1407_v58  ;;  %v1313_v61 = vmul.f32 %v3062_v13, %v2992_v29  ;;  %v1778_v29 = vmul.f32 %v3062_v13, %v3012_v39  ;;  %v4172_v39 = vld [vmem:[#allocation15_spill] sm:$0xff] }
 0x2f7   : > { %1440 = vst [vmem:[%s3699_s12] sm:$0xff] %v1424_v7  ;;  %v1519_v62 = vpop.permute.xlu1 %1518  ;;  %v1825_v15 = vpop.permute.xlu0 %1824  ;;  %v1315_v13 = vmul.f32 %v4172_v39, %v4171_v54  ;;  %v1780_v4 = vmul.f32 %v4172_v39, %v4179_v27 }
 0x2f8   : > { %v1615_v48 = vsel %vm1070_vm0, %v1519_v62, %v1583_v26  ;;  %v1872_v50 = vadd.f32 %v1825_v15, %v1776_v40  ;;  %v4180_v62 = vld [vmem:[#allocation58_spill] sm:$0xff]  ;;  %v4181_v15 = vld [vmem:[#allocation60_spill] sm:$0xff] }
 0x2f9   : > { %v3703_v30 = vmul.f32 %v1615_v48, %v925_v41  ;;  %v1606_v48 = vsel %vm1070_vm0, %v4181_v15, %v4180_v62  ;;  %v4198_v15 = vld [vmem:[#allocation47_spill] sm:$0xff] }
 0x2fa   : > { %v1888_v43 = vsel %vm1423_vm1, %v3218_v9, %v1872_v50  ;;  %v1312_v9 = vmul.f32 %v3060_v55, %v2933_v14  ;;  %v1777_v14 = vmul.f32 %v3060_v55, %v2973_v10  ;;  %v4177_v55 = vld [vmem:[#allocation9_spill] sm:$0xff]  ;;  %v4182_v50 = vld [vmem:[#allocation10_spill] sm:$0xff] }
 0x2fb   : > { %1904 = vst [vmem:[%s3710_s18] sm:$0xff] %v1888_v43  ;;  %v1695_v5 = vpop.permute.xlu1 %1694  ;;  %v1364_v53 = vpop.permute.xlu0 %1363  ;;  %v1314_v47 = vmul.f32 %v4178_v1, %v4177_v55  ;;  %v1779_v43 = vmul.f32 %v4178_v1, %v4182_v50  ;;  %v4194_v55 = vld [vmem:[#allocation57_spill] sm:$0xff] }
 0x2fc   : > { %v1775_v59 = vsel %vm1070_vm0, %v1695_v5, %v1743_v16  ;;  %v1409_v57 = vadd.f32 %v1364_v53, %v1313_v61  ;;  %v4176_v16 = vld [vmem:[#allocation44_spill] sm:$0xff]  ;;  %v2344_v61 = vld [vmem:[%s2814_s24 + $0x30] sm:$0xff] }
 0x2fd   : > { %v1807_v38 = vmul.f32 %v1775_v59, %v925_v41  ;;  %v4183_v5 = vld [vmem:[#allocation19_spill] sm:$0xff] }
 0x2fe   : > { %v1426_v37 = vsel %vm1423_vm1, %v3255_v19, %v1409_v57  ;;  %v1093_v53 = vmul.f32 %v2344_v61, %v4183_v5  ;;  %v4184_v59 = vld [vmem:[#allocation39_spill] sm:$0xff] }
 0x2ff   : > { %1442 = vst [vmem:[%s3699_s12 + $0x10] sm:$0xff] %v1426_v37  ;;  %1854 = vrot.lane.b32.xlu1 %v1807_v38, %s2473_s21  ;;  %v1362_v25 = vpop.permute.xlu1 %1361  ;;  %v1829_v2 = vpop.permute.xlu0 %1828  ;;  %v4185_v38 = vld [vmem:[#allocation49_spill] sm:$0xff]  ;;  %s3896_s21 = sshll.u32 %s2547_s9, 11 }
 0x300   : > { %v1408_v42 = vadd.f32 %v1362_v25, %v1312_v9  ;;  %v1874_v44 = vadd.f32 %v1829_v2, %v1778_v29  ;;  %v4186_v9 = vld [vmem:[#allocation17_spill] sm:$0xff]  ;;  %v4187_v25 = vld [vmem:[#allocation50_spill] sm:$0xff]  ;;  %v4188_v2 = vld [vmem:[#allocation52_spill] sm:$0xff]  ;;  %s3904_s25 = scalar_lea.hbm %s4044_s6, %s3896_s21 }
 0x301   : > { %v1317_v29 = vmul.f32 %v4186_v9, %v4183_v5 }
 0x302   : > { %v1425_v41 = vsel %vm1423_vm1, %v3191_v33, %v1408_v42  ;;  %v1890_v19 = vsel %vm1423_vm1, %v3298_v8, %v1874_v44  ;;  %v1077_v33 = vsel %vm1070_vm0, %v4174_v49, %v4173_v51  ;;  %v1605_v42 = vsel %vm1070_vm0, %v4188_v2, %v4187_v25  ;;  %v4192_v51 = vld [vmem:[#allocation42_spill] sm:$0xff]  ;;  %v4200_v25 = vld [vmem:[#allocation25_spill] sm:$0xff] }
 0x303   : > { %1441 = vst [vmem:[%s3699_s12 + $0x8] sm:$0xff] %v1425_v41  ;;  %1906 = vst [vmem:[%s3710_s18 + $0x10] sm:$0xff] %v1890_v19  ;;  %v1827_v52 = vpop.permute.xlu1 %1826  ;;  %v1368_v23 = vpop.permute.xlu0 %1367  ;;  %v1109_v58 = vmul.f32 %v1077_v33, %v3575_v56 }
 0x304   : > { %v1873_v60 = vadd.f32 %v1827_v52, %v1777_v14  ;;  %v1411_v6 = vadd.f32 %v1368_v23, %v1315_v13  ;;  %v1638_v14 = vmul.f32 %v1606_v48, %v3575_v56  ;;  %v4189_v13 = vld [vmem:[#allocation12_spill] sm:$0xff] }
 0x305   : > { %v1125_v19 = vadd.f32 %v1109_v58, %v1093_v53  ;;  %v4190_v52 = vld [vmem:[#allocation16_spill] sm:$0xff] }
 0x306   : > { %v1889_v8 = vsel %vm1423_vm1, %v4175_v36, %v1873_v60  ;;  %v1428_v10 = vsel %vm1423_vm1, %v4176_v16, %v1411_v6  ;;  %v1316_v23 = vmul.f32 %v4190_v52, %v4189_v13  ;;  %v4191_v60 = vld [vmem:[#allocation27_spill] sm:$0xff] }
 0x307   : > { %1905 = vst [vmem:[%s3710_s18 + $0x8] sm:$0xff] %v1889_v8  ;;  %1444 = vst [vmem:[%s3699_s12 + $0x20] sm:$0xff] %v1428_v10  ;;  %v1366_v26 = vpop.permute.xlu1 %1365  ;;  %v1833_v17 = vpop.permute.xlu0 %1832  ;;  %v1622_v6 = vmul.f32 %v2344_v61, %v4191_v60  ;;  %v1782_v36 = vmul.f32 %v4186_v9, %v4191_v60  ;;  %v1637_v8 = vmul.f32 %v1605_v42, %v3359_v11  ;;  %v4193_v10 = vld [vmem:[#allocation56_spill] sm:$0xff]  ;;  %v4201_v42 = vld [vmem:[#allocation62_spill] sm:$0xff] }
 0x308   : > { %v1410_v7 = vadd.f32 %v1366_v26, %v1314_v47  ;;  %v1876_v40 = vadd.f32 %v1833_v17, %v1780_v4  ;;  %v1078_v1 = vsel %vm1070_vm0, %v4194_v55, %v4193_v10  ;;  %v4195_v26 = vld [vmem:[#allocation18_spill] sm:$0xff]  ;;  %v4196_v17 = vld [vmem:[#allocation45_spill] sm:$0xff]  ;;  %v2347_v10 = vld [vmem:[%s2814_s24 + $0x50] sm:$0xff] }
 0x309   : > { %v1654_v47 = vadd.f32 %v1638_v14, %v1622_v6  ;;  %v1621_v58 = vmul.f32 %v4196_v17, %v4195_v26  ;;  %v1781_v11 = vmul.f32 %v4190_v52, %v4195_v26  ;;  %v1110_v5 = vmul.f32 %v1078_v1, %v3615_v46  ;;  %v4206_v55 = vld [vmem:[#allocation37_spill] sm:$0xff] }
 0x30a   : > { %v1427_v57 = vsel %vm1423_vm1, %v4184_v59, %v1410_v7  ;;  %v1892_v37 = vsel %vm1423_vm1, %v4185_v38, %v1876_v40  ;;  %v2345_v7 = vld [vmem:[%s2814_s24 + $0x40] sm:$0xff]  ;;  %v4197_v40 = vld [vmem:[#allocation32_spill] sm:$0xff]  ;;  %v1097_v1 = vmul.f32 %v2347_v10, %v4206_v55 }
 0x30b   : > { %1443 = vst [vmem:[%s3699_s12 + $0x18] sm:$0xff] %v1427_v57  ;;  %1908 = vst [vmem:[%s3710_s18 + $0x20] sm:$0xff] %v1892_v37  ;;  %v1831_v44 = vpop.permute.xlu1 %1830  ;;  %v1372_v41 = vpop.permute.xlu0 %1371  ;;  %v1095_v62 = vmul.f32 %v2345_v7, %v4197_v40  ;;  %v1653_v57 = vadd.f32 %v1637_v8, %v1621_v58  ;;  %v4205_v8 = vld [vmem:[#allocation31_spill] sm:$0xff] }
 0x30c   : > { %v1875_v54 = vadd.f32 %v1831_v44, %v1779_v43  ;;  %v1413_v39 = vadd.f32 %v1372_v41, %v1317_v29  ;;  %v4199_v43 = vld [vmem:[#allocation21_spill] sm:$0xff]  ;;  %v2346_v29 = vld [vmem:[%s2814_s24 + $0x38] sm:$0xff]  ;;  %v4202_v44 = vld [vmem:[#allocation63_spill] sm:$0xff]  ;;  %v1129_v58 = vadd.f32 %v3601_v45, %v1097_v1 }
 0x30d   : > { %v1319_v61 = vmul.f32 %v4199_v43, %v4197_v40  ;;  %v1127_v38 = vadd.f32 %v3495_v18, %v1095_v62  ;;  %v1094_v2 = vmul.f32 %v2346_v29, %v4200_v25  ;;  %v1607_v41 = vsel %vm1070_vm0, %v4202_v44, %v4201_v42  ;;  %v2348_v40 = vld [vmem:[%s2814_s24 + $0x48] sm:$0xff]  ;;  %v4208_v62 = vld [vmem:[#allocation33_spill] sm:$0xff]  ;;  %v2349_v44 = vld [vmem:[%s2814_s24 + $0x58] sm:$0xff] }
 0x30e   : > { %v1891_v49 = vsel %vm1423_vm1, %v4192_v51, %v1875_v54  ;;  %v1430_v33 = vsel %vm1423_vm1, %v1125_v19, %v1413_v39  ;;  %v4203_v19 = vld [vmem:[#allocation20_spill] sm:$0xff]  ;;  %v4204_v54 = vld [vmem:[#allocation34_spill] sm:$0xff]  ;;  %v1639_v51 = vmul.f32 %v1607_v41, %v3615_v46  ;;  %v4207_v46 = vld [vmem:[#allocation23_spill] sm:$0xff] }
 0x30f   : > { %1907 = vst [vmem:[%s3710_s18 + $0x18] sm:$0xff] %v1891_v49  ;;  %1446 = vst [vmem:[%s3699_s12 + $0x30] sm:$0xff] %v1430_v33  ;;  %v1370_v56 = vpop.permute.xlu1 %1369  ;;  %v1837_v16 = vpop.permute.xlu0 %1836  ;;  %v1318_v14 = vmul.f32 %v4203_v19, %v4200_v25  ;;  %v1624_v39 = vmul.f32 %v2345_v7, %v4204_v54  ;;  %v1784_v18 = vmul.f32 %v4199_v43, %v4204_v54  ;;  %v4209_v43 = vld [vmem:[#allocation22_spill] sm:$0xff]  ;;  %v4211_v25 = vld [vmem:[#allocation40_spill] sm:$0xff] }
 0x310   : > { %v1412_v27 = vadd.f32 %v1370_v56, %v1316_v23  ;;  %v1878_v4 = vadd.f32 %v1837_v16, %v1782_v36  ;;  %v1126_v23 = vadd.f32 %v1110_v5, %v1094_v2  ;;  %v1623_v56 = vmul.f32 %v2346_v29, %v4205_v8  ;;  %v4212_v41 = vld [vmem:[#allocation38_spill] sm:$0xff] }
 0x311   : > { %v1656_v49 = vadd.f32 %v3548_v3, %v1624_v39  ;;  %v1783_v16 = vmul.f32 %v4203_v19, %v4205_v8  ;;  %v1321_v3 = vmul.f32 %v4207_v46, %v4206_v55  ;;  %v1626_v2 = vmul.f32 %v2347_v10, %v4211_v25  ;;  %v4216_v1 = vld [vmem:[#allocation26_spill] sm:$0xff] }
 0x312   : > { %v1429_v48 = vsel %vm1423_vm1, %v4198_v15, %v1412_v27  ;;  %v1894_v50 = vsel %vm1423_vm1, %v1654_v47, %v1878_v4  ;;  %v1655_v17 = vadd.f32 %v1639_v51, %v1623_v56  ;;  %v1096_v15 = vmul.f32 %v2348_v40, %v4208_v62 }
 0x313   : > { %1445 = vst [vmem:[%s3699_s12 + $0x28] sm:$0xff] %v1429_v48  ;;  %1910 = vst [vmem:[%s3710_s18 + $0x30] sm:$0xff] %v1894_v50  ;;  %v1835_v53 = vpop.permute.xlu1 %1834  ;;  %v1376_v59 = vpop.permute.xlu0 %1375  ;;  %v1098_v19 = vmul.f32 %v2349_v44, %v4212_v41  ;;  %v1658_v54 = vadd.f32 %v3639_v35, %v1626_v2  ;;  %v4214_v35 = vld [vmem:[#allocation41_spill] sm:$0xff] }
 0x314   : > { %v1877_v37 = vadd.f32 %v1835_v53, %v1781_v11  ;;  %v1415_v9 = vadd.f32 %v1376_v59, %v1319_v61  ;;  %v1320_v61 = vmul.f32 %v4209_v43, %v4208_v62  ;;  %v1128_v53 = vadd.f32 %v3532_v32, %v1096_v15  ;;  %v4210_v59 = vld [vmem:[#allocation36_spill] sm:$0xff]  ;;  %v4222_v2 = vld [vmem:[#allocation29_spill] sm:$0xff] }
 0x315   : > { %v1786_v32 = vmul.f32 %v4207_v46, %v4211_v25  ;;  %v4219_v15 = vld [vmem:[#allocation48_spill] sm:$0xff] }
 0x316   : > { %v1893_v13 = vsel %vm1423_vm1, %v1653_v57, %v1877_v37  ;;  %v1432_v52 = vsel %vm1423_vm1, %v1127_v38, %v1415_v9  ;;  %v1625_v57 = vmul.f32 %v2348_v40, %v4210_v59  ;;  %v1785_v37 = vmul.f32 %v4209_v43, %v4210_v59 }
 0x317   : > { %1909 = vst [vmem:[%s3710_s18 + $0x28] sm:$0xff] %v1893_v13  ;;  %1448 = vst [vmem:[%s3699_s12 + $0x40] sm:$0xff] %v1432_v52  ;;  %v1374_v60 = vpop.permute.xlu1 %1373  ;;  %v1841_v6 = vpop.permute.xlu0 %1840 }
 0x318   : > { %v1414_v33 = vadd.f32 %v1374_v60, %v1318_v14  ;;  %v1880_v36 = vadd.f32 %v1841_v6, %v1784_v18  ;;  %v1657_v29 = vadd.f32 %v3587_v28, %v1625_v57  ;;  %v4213_v28 = vld [vmem:[#allocation24_spill] sm:$0xff] }
 0x319   : > { %v1322_v52 = vmul.f32 %v4213_v28, %v4212_v41 }
 0x31a   : > { %v1431_v47 = vsel %vm1423_vm1, %v1126_v23, %v1414_v33  ;;  %v1896_v27 = vsel %vm1423_vm1, %v1656_v49, %v1880_v36  ;;  %v1130_v23 = vadd.f32 %v3631_v0, %v1098_v19  ;;  %v1627_v49 = vmul.f32 %v2349_v44, %v4214_v35  ;;  %v4215_v0 = vld [vmem:[#allocation43_spill] sm:$0xff] }
 0x31b   : > { %1447 = vst [vmem:[%s3699_s12 + $0x38] sm:$0xff] %v1431_v47  ;;  %1912 = vst [vmem:[%s3710_s18 + $0x40] sm:$0xff] %v1896_v27  ;;  %v1839_v4 = vpop.permute.xlu1 %1838  ;;  %v1380_v26 = vpop.permute.xlu0 %1379  ;;  %v1787_v33 = vmul.f32 %v4213_v28, %v4214_v35  ;;  %v1323_v47 = vmul.f32 %v4216_v1, %v4215_v0 }
 0x31c   : > { %v1879_v11 = vadd.f32 %v1839_v4, %v1783_v16  ;;  %v1417_v7 = vadd.f32 %v1380_v26, %v1321_v3  ;;  %v1659_v8 = vadd.f32 %v3649_v31, %v1627_v49  ;;  %v2350_v16 = vld [vmem:[%s2814_s24 + $0x60] sm:$0xff]  ;;  %v2351_v31 = vld [vmem:[%s2814_s24 + $0x68] sm:$0xff] }
 0x31d   : > { %v1099_v10 = vmul.f32 %v2350_v16, %v4215_v0  ;;  %v4217_v26 = vld [vmem:[#allocation46_spill] sm:$0xff] }
 0x31e   : > { %v1895_v48 = vsel %vm1423_vm1, %v1655_v17, %v1879_v11  ;;  %v1434_v50 = vsel %vm1423_vm1, %v1129_v58, %v1417_v7  ;;  %v1100_v17 = vmul.f32 %v2351_v31, %v4217_v26  ;;  %v4218_v58 = vld [vmem:[#allocation28_spill] sm:$0xff] }
 0x31f   : > { %1911 = vst [vmem:[%s3710_s18 + $0x38] sm:$0xff] %v1895_v48  ;;  %1450 = vst [vmem:[%s3699_s12 + $0x50] sm:$0xff] %v1434_v50  ;;  %v1378_v5 = vpop.permute.xlu1 %1377  ;;  %v1131_v46 = vadd.f32 %v3654_v24, %v1099_v10  ;;  %v1324_v11 = vmul.f32 %v4218_v58, %v4217_v26  ;;  %v1628_v48 = vmul.f32 %v2350_v16, %v4219_v15 }
 0x320   : > { %v1416_v45 = vadd.f32 %v1378_v5, %v1320_v61  ;;  %v1132_v40 = vadd.f32 %v3661_v21, %v1100_v17  ;;  %v1788_v50 = vmul.f32 %v4216_v1, %v4219_v15  ;;  %v4220_v21 = vld [vmem:[#allocation53_spill] sm:$0xff] }
 0x321   : > { %v1660_v61 = vadd.f32 %v3665_v22, %v1628_v48  ;;  %v1789_v59 = vmul.f32 %v4218_v58, %v4220_v21 }
 0x322   : > { %v1433_v38 = vsel %vm1423_vm1, %v1128_v53, %v1416_v45  ;;  %v1629_v45 = vmul.f32 %v2351_v31, %v4220_v21 }
 0x323   : > { %1449 = vst [vmem:[%s3699_s12 + $0x48] sm:$0xff] %v1433_v38  ;;  %v1843_v9 = vpop.permute.xlu1 %1842 }
 0x324   : > { %v1881_v42 = vadd.f32 %v1843_v9, %v1785_v37  ;;  %v1661_v38 = vadd.f32 %v3671_v20, %v1629_v45  ;;  %v2352_v9 = vld [vmem:[%s2814_s24 + $0x70] sm:$0xff]  ;;  %v2353_v20 = vld [vmem:[%s2814_s24 + $0x78] sm:$0xff]  ;;  %s3916_s24 = scalar_lea.sflag [#allocation3], %s333_s19 }
 0x325   : > { %v1845_v14 = vpop.permute.xlu0 %1844 }
 0x326   : > { %v1897_v39 = vsel %vm1423_vm1, %v1657_v29, %v1881_v42  ;;  %v1882_v13 = vadd.f32 %v1845_v14, %v1786_v32  ;;  %v4221_v29 = vld [vmem:[#allocation55_spill] sm:$0xff] }
 0x327   : > { %1913 = vst [vmem:[%s3710_s18 + $0x48] sm:$0xff] %v1897_v39  ;;  %v1382_v18 = vpop.permute.xlu1 %1381  ;;  %v1101_v22 = vmul.f32 %v2352_v9, %v4221_v29  ;;  %v1325_v42 = vmul.f32 %v4222_v2, %v4221_v29  ;;  %v4223_v14 = vld [vmem:[#allocation59_spill] sm:$0xff]  ;;  %v4224_v39 = vld [vmem:[#allocation30_spill] sm:$0xff] }
 0x328   : > { %v1898_v60 = vsel %vm1423_vm1, %v1658_v54, %v1882_v13  ;;  %v1418_v6 = vadd.f32 %v1382_v18, %v1322_v52  ;;  %v1102_v54 = vmul.f32 %v2353_v20, %v4223_v14  ;;  %v1326_v13 = vmul.f32 %v4224_v39, %v4223_v14  ;;  %v4225_v18 = vld [vmem:[#allocation61_spill] sm:$0xff] }
 0x329   : > { %1914 = vst [vmem:[%s3710_s18 + $0x50] sm:$0xff] %v1898_v60  ;;  %v1133_v44 = vadd.f32 %v3676_v63, %v1101_v22 }
 0x32a   : > { %v1435_v51 = vsel %vm1423_vm1, %v1130_v23, %v1418_v6  ;;  %v1134_v63 = vadd.f32 %v3683_v34, %v1102_v54  ;;  %v1630_v23 = vmul.f32 %v2352_v9, %v4225_v18  ;;  %v1790_v6 = vmul.f32 %v4222_v2, %v4225_v18 }
 0x32b   : > { %1451 = vst [vmem:[%s3699_s12 + $0x58] sm:$0xff] %v1435_v51 }
 0x32c   : > { %v1662_v51 = vadd.f32 %v3687_v12, %v1630_v23 }
 0x331   : > { %v1847_v36 = vpop.permute.xlu1 %1846 }
 0x332   : > { %v1883_v56 = vadd.f32 %v1847_v36, %v1787_v33 }
 0x334   : > { %v1899_v55 = vsel %vm1423_vm1, %v1659_v8, %v1883_v56 }
 0x335   : > { %1915 = vst [vmem:[%s3710_s18 + $0x58] sm:$0xff] %v1899_v55  ;;  %v1384_v27 = vpop.permute.xlu0 %1383 }
 0x336   : > { %v1419_v3 = vadd.f32 %v1384_v27, %v1323_v47 }
 0x338   : > { %v1436_v4 = vsel %vm1423_vm1, %v1131_v46, %v1419_v3 }
 0x339   : > { %1452 = vst [vmem:[%s3699_s12 + $0x60] sm:$0xff] %v1436_v4 }
 0x341   : > { %v1386_v7 = vpop.permute.xlu1 %1385 }
 0x342   : > { %v1420_v62 = vadd.f32 %v1386_v7, %v1324_v11 }
 0x344   : > { %v1437_v24 = vsel %vm1423_vm1, %v1132_v40, %v1420_v62 }
 0x345   : > { %1453 = vst [vmem:[%s3699_s12 + $0x68] sm:$0xff] %v1437_v24  ;;  %v1849_v43 = vpop.permute.xlu0 %1848 }
 0x346   : > { %v1884_v5 = vadd.f32 %v1849_v43, %v1788_v50 }
 0x348   : > { %v1900_v53 = vsel %vm1423_vm1, %v1660_v61, %v1884_v5 }
 0x349   : > { %1916 = vst [vmem:[%s3710_s18 + $0x60] sm:$0xff] %v1900_v53 }
 0x351   : > { %v1851_v57 = vpop.permute.xlu1 %1850 }
 0x352   : > { %v1885_v37 = vadd.f32 %v1851_v57, %v1789_v59 }
 0x354   : > { %v1901_v25 = vsel %vm1423_vm1, %v1661_v38, %v1885_v37 }
 0x355   : > { %1917 = vst [vmem:[%s3710_s18 + $0x68] sm:$0xff] %v1901_v25  ;;  %v1388_v32 = vpop.permute.xlu0 %1387 }
 0x356   : > { %v1421_v41 = vadd.f32 %v1388_v32, %v1325_v42 }
 0x358   : > { %v1438_v19 = vsel %vm1423_vm1, %v1133_v44, %v1421_v41 }
 0x359   : > { %1454 = vst [vmem:[%s3699_s12 + $0x70] sm:$0xff] %v1438_v19 }
 0x361   : > { %v1390_v28 = vpop.permute.xlu1 %1389 }
 0x362   : > { %v1422_v52 = vadd.f32 %v1390_v28, %v1326_v13 }
 0x364   : > { %v1439_v60 = vsel %vm1423_vm1, %v1134_v63, %v1422_v52 }
 0x365   : > { %1455 = vst [vmem:[%s3699_s12 + $0x78] sm:$0xff] %v1439_v60  ;;  %v1853_v34 = vpop.permute.xlu0 %1852 }
 0x366   : > { %v1886_v35 = vadd.f32 %v1853_v34, %v1790_v6 }
 0x367   : > { %2367 = shalt.err (!%p2364_p3)
}
 0x368   : > { %s2368_s19 = scalar_lea.hbm %s3904_s25, 2048  ;;  %s2372_s13 = scalar_lea.hbm %s4044_s6, 4096 }
 0x369   : > { %p2369_p4 = scmp.ne.s32.totalorder %s3904_s25, %s2368_s19  ;;  %p2373_p9 = scmp.lt.s32.totalorder %s3904_s25, %s4044_s6 }
 0x36a   : > { %p2374_p10 = scmp.lt.s32.totalorder %s2372_s13, %s2368_s19 }
 0x36b   : > { %p2370_p7 = pnand %p2369_p4, %p2566_p5 }
 0x36c   : > { %p2375_p11 = por %p2374_p10, %p2373_p9 }
 0x36d   : > { %p2371_p8 = pneg %p2370_p7 }
 0x36f   : > { %p2376_p12 = pnand %p2375_p11, %p2371_p8 }
 0x371   : > { %2379 = shalt.err (!%p2376_p12)
}
 0x372   : > { %s2477_s26 = smov 128   ;;  %s2478_s10 = smov 8   ;;  %v1902_v12 = vsel %vm1423_vm1, %v1662_v51, %v1886_v35  ;;  %v4226_v49 = vld [vmem:[#allocation64_spill] sm:$0xff]  ;;  %v1855_v8 = vpop.permute.xlu1 %1854 }
 0x373   : > { %2255 = dma.vmem_to_hbm [thread:$0]  (%p2566_p5), %s3906_s20, 2048, %s3904_s25, %s3916_s24, %s2477_s26, %s2477_s26, %s2478_s10   ;;  %v1631_v33 = vmul.f32 %v2353_v20, %v4226_v49  ;;  %v1791_v36 = vmul.f32 %v4224_v39, %v4226_v49 }
 0x374   : > { %1918 = vst [vmem:[%s3710_s18 + $0x70] sm:$0xff] %v1902_v12  ;;  %s1941_s0 = sand.u32 1, %s2547_s9   ;;  %s1976_s1 = sshll.u32 %s3710_s18, 4  ;;  %s3957_s1 = int_to_ptr.vmem [resolvable:$true] %s1976_s1 }
 0x375   : > { %s1992_s22 = sshll.u32 %s2937_s17, 4  ;;  %v1663_v56 = vadd.f32 %v3703_v30, %v1631_v33  ;;  %v1887_v16 = vadd.f32 %v1855_v8, %v1791_v36  ;;  %s3955_s20 = scalar_lea.hbm %s4045_s7, %s3896_s21  ;;  %s3966_s22 = int_to_ptr.vmem [resolvable:$true] %s1992_s22 }
 0x376   : > { %s3964_s24 = scalar_lea.hbm %s4046_s8, %s3896_s21  ;;  %s3969_s17 = scalar_lea.sflag [#allocation5], %s1941_s0 }
 0x377   : > { %v1903_v0 = vsel %vm1423_vm1, %v1663_v56, %v1887_v16  ;;  %s2380_s12 = scalar_lea.vmem %s3957_s1, 2048  ;;  %s2479_s13 = smov [#allocation4]  }
 0x378   : > { %1919 = vst [vmem:[%s3710_s18 + $0x78] sm:$0xff] %v1903_v0  ;;  %p2381_p13 = scmp.ne.s32.totalorder %s3957_s1, %s2380_s12  ;;  %s2384_s23 = sshll.u32 %s2479_s13, 4  ;;  %s2385_s23 = int_to_ptr.vmem [resolvable:$false] %s2384_s23 }
 0x379   : > { %s2386_s19 = scalar_lea.vmem %s2385_s23, 4096  ;;  %p2387_p2 = scmp.lt.s32.totalorder %s3957_s1, %s2385_s23 }
 0x37a   : > { %p2382_p0 = pnand %p2381_p13, %p2566_p5  ;;  %p2388_p3 = scmp.lt.s32.totalorder %s2386_s19, %s2380_s12 }
 0x37c   : > { %p2383_p1 = pneg %p2382_p0  ;;  %p2389_p4 = por %p2388_p3, %p2387_p2 }
 0x37e   : > { %p2390_p7 = pnand %p2389_p4, %p2383_p1 }
 0x380   : > { %2393 = shalt.err (!%p2390_p7)
}
 0x381   : > { %s2394_s18 = scalar_lea.hbm %s3955_s20, 2048  ;;  %s2398_s9 = scalar_lea.hbm %s4045_s7, 4096 }
 0x382   : > { %p2395_p8 = scmp.ne.s32.totalorder %s3955_s20, %s2394_s18  ;;  %p2399_p11 = scmp.lt.s32.totalorder %s3955_s20, %s4045_s7 }
 0x383   : > { %p2400_p12 = scmp.lt.s32.totalorder %s2398_s9, %s2394_s18 }
 0x384   : > { %p2396_p9 = pnand %p2395_p8, %p2566_p5 }
 0x385   : > { %p2401_p13 = por %p2400_p12, %p2399_p11 }
 0x386   : > { %p2397_p10 = pneg %p2396_p9 }
 0x388   : > { %p2402_p0 = pnand %p2401_p13, %p2397_p10 }
 0x38a   : > { %2405 = shalt.err (!%p2402_p0)
}
 0x38b   : > { %2256 = dma.vmem_to_hbm [thread:$0]  (%p2566_p5), %s3957_s1, 2048, %s3955_s20, %s3969_s17, %s2477_s26, %s2477_s26, %s2478_s10  }
 0x38c   : > { %s2406_s12 = scalar_lea.vmem %s3966_s22, 2048  ;;  %s2480_s23 = smov [#allocation6]  }
 0x38d   : > { %p2407_p1 = scmp.ne.s32.totalorder %s3966_s22, %s2406_s12  ;;  %s2410_s19 = sshll.u32 %s2480_s23, 4  ;;  %s2411_s19 = int_to_ptr.vmem [resolvable:$false] %s2410_s19 }
 0x38e   : > { %s2412_s18 = scalar_lea.vmem %s2411_s19, 4096  ;;  %p2413_p4 = scmp.lt.s32.totalorder %s3966_s22, %s2411_s19 }
 0x38f   : > { %p2408_p2 = pnand %p2407_p1, %p2566_p5  ;;  %p2414_p7 = scmp.lt.s32.totalorder %s2412_s18, %s2406_s12 }
 0x391   : > { %p2409_p3 = pneg %p2408_p2  ;;  %p2415_p8 = por %p2414_p7, %p2413_p4 }
 0x393   : > { %p2416_p9 = pnand %p2415_p8, %p2409_p3 }
 0x395   : > { %2419 = shalt.err (!%p2416_p9)
}
 0x396   : > { %s2420_s21 = scalar_lea.hbm %s3964_s24, 2048  ;;  %s2424_s0 = scalar_lea.hbm %s4046_s8, 4096 }
 0x397   : > { %p2421_p10 = scmp.ne.s32.totalorder %s3964_s24, %s2420_s21  ;;  %p2425_p13 = scmp.lt.s32.totalorder %s3964_s24, %s4046_s8 }
 0x398   : > { %p2426_p0 = scmp.lt.s32.totalorder %s2424_s0, %s2420_s21 }
 0x399   : > { %p2422_p11 = pnand %p2421_p10, %p2566_p5 }
 0x39a   : > { %p2427_p1 = por %p2426_p0, %p2425_p13 }
 0x39b   : > { %p2423_p12 = pneg %p2422_p11 }
 0x39d   : > { %p2428_p2 = pnand %p2427_p1, %p2423_p12 }
 0x39f   : > { %2431 = shalt.err (!%p2428_p2)
}
 0x3a0   : > { %2257 = dma.vmem_to_hbm [thread:$0]  (%p2566_p5), %s3966_s22, 2048, %s3964_s24, %s3969_s17, %s2477_s26, %s2477_s26, %s2478_s10  }
 0x3a1 PF: > { %p2271_p3 = scmp.ge.s32.totalorder %s2470_s30, 2  ;;  %s2007_s13 = sand.u32 1, %s2458_s27  }
 0x3a2   : > { %s2008_s12 = scalar_lea.sflag [#allocation3], %s2007_s13 }
 0x3a3   : > { %p2262_p4 = pnand %p2271_p3, %p2570_p6 }
 0x3a5   : > { %p2263_p7 = pneg %p2262_p4 }
 0x3a7   : > { %2449 = dma.done.wait (%p2263_p7), %s2008_s12, 2048  }
 0x3a8   : > { %2451 = vsyncadd (%p2263_p7), %s2008_s12, 4294965248  ;;  %s4227_s15 = sadd.s32 4294967294, %s2470_s30  }
 0x3a9   : > { %s2016_s23 = sand.u32 1, %s4227_s15  }
 0x3aa   : > { %s2017_s19 = scalar_lea.sflag [#allocation5], %s2016_s23 }
 0x3ab   : > { %2453 = dma.done.wait (%p2263_p7), %s2017_s19, 4096  }
 0x3ac   : > { %2455 = vsyncadd (%p2263_p7), %s2017_s19, 4294963200  ;;  %p22_p5 = scmp.ge.s32.totalorder %s2551_s11, 4   ;;  %s4228_s27 = smov %s2462_s28 }
 0x3ad   : > { %s4229_s28 = smov %s2466_s29  ;;  %s4230_s29 = smov %s2564_s14 }
 0x3ae   : > { %s4231_s30 = smov %s2551_s11  ;;  %24 = sbr.rel (!%p22_p5) target bundleno = 8 (0x8), region = 117 }
 0x3b3   :  { %2031 = vsyncpa [#allocation3], 1 }
 0x3b4   :  { %2033 = vsyncpa [#allocation3 + $0x1], 1 }
 0x3b5   :  { %2034 = vsyncpa [#allocation5], 1 }
 0x3b6   :  { %2036 = vsyncpa [#allocation5 + $0x1], 1 }

</bundles_post_ra>
